<compile_context>
chip_gen: v7x
topology: tpu7x:2x2x1
jax: 0.10.0
libtpu: 0.0.40
codegen_flags: <defaults>
</compile_context>

<pallas_src>
import jax
import jax.numpy as jnp
from jax.experimental import pallas as pl
from jax.experimental.pallas import tpu as pltpu


def _inr_kernel(xT_ref, w1T_ref, w2T_ref, b2_ref, w3_ref, out_ref):
    # Transposed ("batch on lanes") layout: activations are (H, TILE_N).

    # Layer 1 + Sine.  Single bf16 MXU pass; b1 and w0 are already folded into
    # the (H, 4) weight / constant-1 input row, so there is no bias add here.
    h1 = jnp.sin(
        jnp.dot(w1T_ref[...], xT_ref[...],
                preferred_element_type=jnp.float32)                   # (H, TN) f32
    )

    # Layer 2 + Sine: bf16 MXU inputs, f32 accumulation; bias add and sin in f32.
    h2 = jnp.sin(
        jnp.dot(w2T_ref[...], h1.astype(jnp.bfloat16),
                preferred_element_type=jnp.float32)                   # (H, TN) f32
        + b2_ref[...]
    )

    # Layer 3 (no bias): M=1 output -> avoid the MXU.  Broadcast-multiply by the
    # w3 column on the VPU and reduce over the sublane axis on the XLU.
    out_ref[...] = jnp.sum(h2 * w3_ref[...], axis=0, keepdims=True)   # (1, TN) f32


def kernel_inr_polar(cord, params, *, w0=1.0, tile_n=8192):
    """JAX/Pallas equivalent of KernelINR_Polar.forward.

    cord: float array of shape (..., 3)
    returns: float32 array of shape (...,)  (last dim squeezed)
    """
    w1, b1, w2, b2, w3 = params
    hidden = w1.shape[1]

    batch_shape = cord.shape[:-1]
    n = 1
    for d in batch_shape:
        n *= d

    # Fold w0 and b1 into the first-layer weights (one-time, wrapper-side):
    #   W1^T <- [ (w1*w0)^T | (b1*w0) ]  of shape (H, 4), bf16 for a single MXU pass.
    w1T4 = jnp.concatenate(
        [(w1 * w0).T, (b1 * w0).reshape(hidden, 1)], axis=1
    ).astype(jnp.bfloat16)                                    # (H, 4)
    # NOTE: for very large SIREN w0 the bf16 fold of w0 into W2/b2 loses absolute
    # accuracy in the layer-2 sine argument; keep W2 in f32 in that regime.
    w2T = (w2 * w0).T.astype(jnp.bfloat16)                    # (H, H) bf16 for MXU
    b2c = (b2 * w0).reshape(hidden, 1).astype(jnp.float32)    # (H, 1) f32
    w3c = w3.reshape(hidden, 1).astype(jnp.float32)           # (H, 1) f32 (VPU/XLU path)

    # Lane-dense coordinates: (4, N) = [x; y; z; 1] with rows on lanes, bf16.
    xT = cord.reshape(n, 3).astype(jnp.float32).T             # (3, N)
    xT4 = jnp.concatenate(
        [xT, jnp.ones((1, n), jnp.float32)], axis=0
    ).astype(jnp.bfloat16)                                    # (4, N)

    # Large row tiles to amortize the ~0.35 us per-grid-step overhead; shrink
    # for tiny inputs (tile must stay a multiple of 128 lanes).
    tile = min(tile_n, ((n + 127) // 128) * 128)
    n_pad = ((n + tile - 1) // tile) * tile
    if n_pad != n:
        # Only the ragged tail gets padded columns (garbage cols sliced off below).
        xT4 = jnp.pad(xT4, ((0, 0), (0, n_pad - n)))

    grid = (n_pad // tile,)
    out = pl.pallas_call(
        _inr_kernel,
        out_shape=jax.ShapeDtypeStruct((1, n_pad), jnp.float32),
        grid_spec=pltpu.PrefetchScalarGridSpec(
            num_scalar_prefetch=0,
            grid=grid,
            in_specs=[
                pl.BlockSpec((4, tile), lambda i: (0, i)),         # [cord; 1]^T tile (bf16)
                pl.BlockSpec((hidden, 4), lambda i: (0, 0)),       # [W1^T | b1] (w0 folded, bf16)
                pl.BlockSpec((hidden, hidden), lambda i: (0, 0)),  # W2^T (w0 folded, bf16)
                pl.BlockSpec((hidden, 1), lambda i: (0, 0)),       # b2   (w0 folded, f32)
                pl.BlockSpec((hidden, 1), lambda i: (0, 0)),       # w3 column (f32)
            ],
            out_specs=pl.BlockSpec((1, tile), lambda i: (0, i)),   # lane-dense output
        ),
        compiler_params=pltpu.CompilerParams(
            dimension_semantics=("parallel",),
        ),
    )(xT4, w1T4, w2T, b2c, w3c)

    return out[0, :n].reshape(batch_shape)


def init_params(key, hidden_dim=64):
    """Deterministic init mimicking nn.Linear default: U(-1/sqrt(fan_in), 1/sqrt(fan_in))."""
    k1, k2, k3, k4, k5 = jax.random.split(key, 5)

    def uni(k, shape, fan_in):
        bound = 1.0 / jnp.sqrt(fan_in)
        return jax.random.uniform(k, shape, jnp.float32, -bound, bound)

    w1 = uni(k1, (3, hidden_dim), 3.0)
    b1 = uni(k2, (1, hidden_dim), 3.0)
    w2 = uni(k3, (hidden_dim, hidden_dim), float(hidden_dim))
    b2 = uni(k4, (1, hidden_dim), float(hidden_dim))
    w3 = uni(k5, (hidden_dim, 1), float(hidden_dim))
    return (w1, b1, w2, b2, w3)


def reference_forward(cord, params, w0=1.0):
    w1, b1, w2, b2, w3 = params
    h1 = jnp.sin(w0 * (cord @ w1 + b1[0]))
    h2 = jnp.sin(w0 * (h1 @ w2 + b2[0]))
    return (h2 @ w3)[..., 0]


if __name__ == "__main__":
    key = jax.random.PRNGKey(0)
    kp, kx = jax.random.split(key)

    hidden_dim = 64
    w0 = 1.0
    params = init_params(kp, hidden_dim)

    # Small "coordinate grid" style input: (batch, H, W, 3) -> 128 rows total.
    cord = jax.random.uniform(kx, (2, 8, 8, 3), jnp.float32, -1.0, 1.0)

    out = kernel_inr_polar(cord, params, w0=w0)
    out = jax.block_until_ready(out)

    ref = reference_forward(cord, params, w0=w0)
    assert out.shape == cord.shape[:-1], (out.shape, cord.shape)
    # Layers 1/2 feed bf16 to the MXU (f32 accumulation) -> relaxed tolerance.
    max_err = float(jnp.max(jnp.abs(out - ref)))
    assert jnp.allclose(out, ref, atol=2e-2, rtol=2e-2), ("mismatch vs reference", max_err)

    print("KERNEL_OK")
</pallas_src>

<mosaic_0001>
module attributes {stable_mosaic.version = 11 : i64} {
  func.func @_inr_kernel(%arg0: i32, %arg1: memref<4x128xbf16, #tpu.memory_space<vmem>>, %arg2: memref<64x4xbf16, #tpu.memory_space<vmem>>, %arg3: memref<64x64xbf16, #tpu.memory_space<vmem>>, %arg4: memref<64x1xf32, #tpu.memory_space<vmem>>, %arg5: memref<64x1xf32, #tpu.memory_space<vmem>>, %arg6: memref<1x128xf32, #tpu.memory_space<vmem>>) attributes {dimension_semantics = [#tpu.dimension_semantics<parallel>], iteration_bounds = array<i64: 1>, scalar_prefetch = 0 : i64, scratch_operands = 0 : i64, tpu.core_type = #tpu.core_type<tc>, window_params = [{transform_indices = @transform_0, window_bounds = array<i64: 4, 128>}, {pipeline_mode = #tpu.pipeline_mode<synchronous>, transform_indices = @transform_1, window_bounds = array<i64: 64, 4>}, {pipeline_mode = #tpu.pipeline_mode<synchronous>, transform_indices = @transform_2, window_bounds = array<i64: 64, 64>}, {pipeline_mode = #tpu.pipeline_mode<synchronous>, transform_indices = @transform_3, window_bounds = array<i64: 64, 1>}, {pipeline_mode = #tpu.pipeline_mode<synchronous>, transform_indices = @transform_4, window_bounds = array<i64: 64, 1>}, {transform_indices = @transform_5, window_bounds = array<i64: 1, 128>}]} {
    %c0 = arith.constant 0 : index
    %c0_0 = arith.constant 0 : index
    %0 = vector.load %arg2[%c0, %c0_0] : memref<64x4xbf16, #tpu.memory_space<vmem>>, vector<64x4xbf16>
    %c0_1 = arith.constant 0 : index
    %c0_2 = arith.constant 0 : index
    %1 = vector.load %arg1[%c0_1, %c0_2] : memref<4x128xbf16, #tpu.memory_space<vmem>>, vector<4x128xbf16>
    %cst = arith.constant dense<0.000000e+00> : vector<64x128xf32>
    %2 = tpu.matmul %0, %1, %cst {dimension_numbers = #tpu.dot_dimension_numbers<[1], [0], [0], [1], [0, 0, 1, 1], [], []>} : vector<64x4xbf16>, vector<4x128xbf16>, vector<64x128xf32> -> vector<64x128xf32>
    %3 = math.sin %2 : vector<64x128xf32>
    %c0_3 = arith.constant 0 : index
    %c0_4 = arith.constant 0 : index
    %4 = vector.load %arg3[%c0_3, %c0_4] : memref<64x64xbf16, #tpu.memory_space<vmem>>, vector<64x64xbf16>
    %5 = arith.truncf %3 : vector<64x128xf32> to vector<64x128xbf16>
    %cst_5 = arith.constant dense<0.000000e+00> : vector<64x128xf32>
    %6 = tpu.matmul %4, %5, %cst_5 {dimension_numbers = #tpu.dot_dimension_numbers<[1], [0], [0], [1], [0, 0, 1, 1], [], []>} : vector<64x64xbf16>, vector<64x128xbf16>, vector<64x128xf32> -> vector<64x128xf32>
    %c0_6 = arith.constant 0 : index
    %c0_7 = arith.constant 0 : index
    %7 = vector.load %arg4[%c0_6, %c0_7] : memref<64x1xf32, #tpu.memory_space<vmem>>, vector<64x1xf32>
    %8 = vector.broadcast %7 : vector<64x1xf32> to vector<64x128xf32>
    %9 = arith.addf %6, %8 : vector<64x128xf32>
    %10 = math.sin %9 : vector<64x128xf32>
    %c0_8 = arith.constant 0 : index
    %c0_9 = arith.constant 0 : index
    %11 = vector.load %arg5[%c0_8, %c0_9] : memref<64x1xf32, #tpu.memory_space<vmem>>, vector<64x1xf32>
    %12 = vector.broadcast %11 : vector<64x1xf32> to vector<64x128xf32>
    %13 = arith.mulf %10, %12 : vector<64x128xf32>
    %cst_10 = arith.constant dense<0.000000e+00> : vector<128xf32>
    %14 = vector.multi_reduction <add>, %13, %cst_10 [0] : vector<64x128xf32> to vector<128xf32>
    %15 = vector.shape_cast %14 : vector<128xf32> to vector<1x128xf32>
    %c0_11 = arith.constant 0 : index
    %c0_12 = arith.constant 0 : index
    %16 = vector.load %arg6[%c0_11, %c0_12] : memref<1x128xf32, #tpu.memory_space<vmem>>, vector<1x128xf32>
    tpu.vector_store %arg6[%c0_11, %c0_12], %15 {strides = array<i32>} : memref<1x128xf32, #tpu.memory_space<vmem>>, vector<1x128xf32>,
    return
  }
  func.func @transform_0(%arg0: i32) -> (i32, i32) {
    %c0_i32 = arith.constant 0 : i32
    %c0_i32_0 = arith.constant 0 : i32
    return %c0_i32, %arg0 : i32, i32
  }
  func.func @transform_1(%arg0: i32) -> (i32, i32) {
    %c0_i32 = arith.constant 0 : i32
    %c0_i32_0 = arith.constant 0 : i32
    %c0_i32_1 = arith.constant 0 : i32
    return %c0_i32, %c0_i32_0 : i32, i32
  }
  func.func @transform_2(%arg0: i32) -> (i32, i32) {
    %c0_i32 = arith.constant 0 : i32
    %c0_i32_0 = arith.constant 0 : i32
    %c0_i32_1 = arith.constant 0 : i32
    return %c0_i32, %c0_i32_0 : i32, i32
  }
  func.func @transform_3(%arg0: i32) -> (i32, i32) {
    %c0_i32 = arith.constant 0 : i32
    %c0_i32_0 = arith.constant 0 : i32
    %c0_i32_1 = arith.constant 0 : i32
    return %c0_i32, %c0_i32_0 : i32, i32
  }
  func.func @transform_4(%arg0: i32) -> (i32, i32) {
    %c0_i32 = arith.constant 0 : i32
    %c0_i32_0 = arith.constant 0 : i32
    %c0_i32_1 = arith.constant 0 : i32
    return %c0_i32, %c0_i32_0 : i32, i32
  }
  func.func @transform_5(%arg0: i32) -> (i32, i32) {
    %c0_i32 = arith.constant 0 : i32
    %c0_i32_0 = arith.constant 0 : i32
    return %c0_i32, %arg0 : i32, i32
  }
}

</mosaic_0001>

<bundles_post_ra>
// kernel: tpu_custom_call.1
= control target key start
LH: loop header
LB: loop body
LE: loop exit
PB: predicated region body
PF: predicated region fallthrough
CT: control target
= control target key end

     0   :  { %vm64_vm0 = vcmask 1041408   ;;  %vm51_vm1 = vcmask 31744   ;;  %s3865_s0 = inlined_call_operand.vmem [shape: bf16[4,128], index: 0, kind: input, shape index: {}]   ;;  %s3866_s1 = inlined_call_operand.vmem [shape: bf16[64,4], index: 1, kind: input, shape index: {}]   ;;  %s3867_s2 = inlined_call_operand.vmem [shape: bf16[64,64], index: 2, kind: input, shape index: {}]   ;;  %s3868_s3 = inlined_call_operand.vmem [shape: f32[64,1], index: 3, kind: input, shape index: {}]   ;;  %s3869_s4 = inlined_call_operand.vmem [shape: f32[64,1], index: 4, kind: input, shape index: {}]   ;;  %s3870_s5 = inlined_call_operand.hbm [shape: f32[1,128], index: 5, kind: output, shape index: {}]  }
   0x1   :  { %v30_v0 = vld [vmem:[%s3865_s0] sm:$0x3]  ;;  %v2242_v3 = vld [vmem:[%s3866_s1 + $0x8] sm:$0xff]   ;;  %v2243_v4 = vld [vmem:[%s3866_s1 + $0x10] sm:$0xff]  }
   0x2   :  { %v2241_v1 = vld [vmem:[%s3866_s1] sm:$0xff]   ;;  %2166 = vmatprep.subr.msk.bf16.mxu0 %vm64_vm0, %v30_v0  ;;  %v66_v2 = vsel %vm64_vm0, %v30_v0, 0 }
   0x3   :  { %2133 = vmatpush3.bf16.msra.mxu0 %v66_v2  ;;  %2134 = vmatprep.mubr.msk.bf16.mxu0 %vm51_vm1, %v2241_v1 }
   0x6   :  { %2135 = vmatmul.mubr.msk.bf16.vlgmr.msra.gmra.mrb[0].mxu0 %vm51_vm1, %v2242_v3 }
   0x7   :  { %2138 = vmatprep.mubr.msk.bf16.mxu0 %vm51_vm1, %v2243_v4 }
   0x8   :  { %10 = vsyncpa [#allocation3], 0  ;;  %v2244_v5 = vld [vmem:[%s3866_s1 + $0x18] sm:$0xff]   ;;  %v3879_v40 = vmov 683565275  }
   0x9   :  { %v2338_v44 = vmov 2475754826   ;;  %v2339_v46 = vmov 2131351028   ;;  %v2340_v48 = vmov 2102212464  }
   0xa   :  { %v3881_v50 = vmov 920167782   ;;  %v3872_v57 = vmov 1326507024  }
   0xe   :  { %2139 = vmatmul.mubr.msk.bf16.gmra.mrb[4].mxu0 %vm51_vm1, %v2244_v5 }
  0xd9   :  { %v2390_v6 = vpop.f32.mrb[0].mxu0 }
  0xda   :  { %v341_v7 = vand.u32 2147483647, %v2390_v6  ;;  %v344_v8 = vand.u32 2139095040, %v2390_v6  ;;  %v2394_v9 = vpop.f32.mrb[1].mxu0 }
  0xdb   :  { %v133_v10 = vand.u32 2147483647, %v2394_v9  ;;  %v136_v11 = vand.u32 2139095040, %v2394_v9  ;;  %v2398_v12 = vpop.f32.mrb[2].mxu0 }
  0xdc   :  { %v345_v13 = vshrl.u32 %v344_v8, 23  ;;  %v348_v14 = vand.u32 8388607, %v341_v7  ;;  %v448_v17 = vand.u32 2139095040, %v2398_v12  ;;  %v2405_v19 = vpop.f32.mrb[3].mxu0 }
  0xdd   :  { %v137_v15 = vshrl.u32 %v136_v11, 23  ;;  %v140_v16 = vand.u32 8388607, %v133_v10  ;;  %v445_v37 = vand.u32 2147483647, %v2398_v12 }
  0xde   :  { %v2055_v18 = vadd.s32 4294967169, %v345_v13  ;;  %v449_v21 = vshrl.u32 %v448_v17, 23  ;;  %v349_v23 = vor.u32 8388608, %v348_v14 }
  0xdf   :  { %v2047_v20 = vadd.s32 4294967169, %v137_v15  ;;  %v141_v24 = vor.u32 8388608, %v140_v16 }
  0xe0   :  { %v351_v22 = vadd.s32 1, %v2055_v18  ;;  %v2059_v26 = vadd.s32 4294967169, %v449_v21  ;;  %v2415_v35 = vshll.u32 %v349_v23, 8 }
  0xe1   :  { %v143_v25 = vadd.s32 1, %v2047_v20  ;;  %v2407_v27 = vpop.f32.mrb[4].mxu0  ;;  %v2417_v36 = vshll.u32 %v141_v24, 8 }
  0xe2   :  { %vm352_vm2 = vcmp.gt.s32.totalorder %v351_v22, 0  ;;  %v2409_v28 = vpop.f32.mrb[5].mxu0  ;;  %v2420_v38 = vadd.s32 1, %v2059_v26 }
  0xe3   :  { %v353_v29 = vsel %vm352_vm2, %v351_v22, 0  ;;  %vm144_vm3 = vcmp.gt.s32.totalorder %v143_v25, 0  ;;  %v2411_v30 = vpop.f32.mrb[6].mxu0 }
  0xe4   :  { %v354_v31 = vshrl.u32 %v353_v29, 5  ;;  %v355_v32 = vand.u32 31, %v353_v29  ;;  %v145_v33 = vsel %vm144_vm3, %v143_v25, 0  ;;  %v2413_v34 = vpop.f32.mrb[7].mxu0  ;;  %vm456_vm8 = vcmp.gt.s32.totalorder %v2420_v38, 0 }
  0xe5   :  { %v2423_v42 = vshrl.u32 %v145_v33, 5  ;;  %v147_v43 = vand.u32 31, %v145_v33 }
  0xe6   :  { %v356_v39 = vsub.s32 32, %v355_v32  ;;  %v358_v41 = vshll.u32 %v3879_v40, %v355_v32  ;;  %v361_v45 = vshll.u32 %v2338_v44, %v355_v32  ;;  %v364_v47 = vshll.u32 %v2339_v46, %v355_v32 }
  0xe7   :  { %v367_v49 = vshll.u32 %v2340_v48, %v355_v32  ;;  %v370_v51 = vshll.u32 %v3881_v50, %v355_v32  ;;  %vm373_vm4 = vcmp.lt.s32.totalorder %v354_v31, 1  ;;  %vm374_vm5 = vcmp.lt.s32.totalorder %v354_v31, 2 }
  0xe8   :  { %v359_v52 = vshrl.u32 %v2338_v44, %v356_v39  ;;  %v362_v53 = vshrl.u32 %v2339_v46, %v356_v39  ;;  %v365_v54 = vshrl.u32 %v2340_v48, %v356_v39  ;;  %v357_v55 = vshrl.u32 %v3879_v40, %v356_v39 }
  0xe9   :  { %v368_v56 = vshrl.u32 %v3881_v50, %v356_v39  ;;  %v371_v58 = vshrl.u32 %v3872_v57, %v356_v39  ;;  %v148_v62 = vsub.s32 32, %v147_v43  ;;  %vm375_vm6 = vcmp.lt.s32.totalorder %v354_v31, 3 }
  0xea   :  { %v360_v59 = vor.u32 %v359_v52, %v358_v41  ;;  %v363_v60 = vor.u32 %v362_v53, %v361_v45  ;;  %v366_v61 = vor.u32 %v365_v54, %v364_v47  ;;  %vm376_vm7 = vcmp.lt.s32.totalorder %v354_v31, 4 }
  0xeb   :  { %v369_v63 = vor.u32 %v368_v56, %v367_v49  ;;  %v372_v0 = vor.u32 %v371_v58, %v370_v51  ;;  %v150_v13 = vshll.u32 %v3879_v40, %v147_v43  ;;  %v151_v16 = vshrl.u32 %v2338_v44, %v148_v62 }
  0xec   :  { %v377_v1 = vsel %vm373_vm4, %v357_v55, %v360_v59  ;;  %v378_v2 = vsel %vm376_vm7, %v366_v61, 2102212464  ;;  %v381_v3 = vsel %vm373_vm4, %v360_v59, %v363_v60  ;;  %v385_v4 = vsel %vm373_vm4, %v363_v60, %v366_v61 }
  0xed   :  { %v379_v5 = vsel %vm375_vm6, %v363_v60, %v378_v2  ;;  %v382_v8 = vsel %vm376_vm7, %v369_v63, 920167782  ;;  %v386_v11 = vsel %vm376_vm7, %v372_v0, 1326507024  ;;  %v153_v17 = vshll.u32 %v2338_v44, %v147_v43 }
  0xee   :  { %v383_v14 = vsel %vm375_vm6, %v366_v61, %v382_v8  ;;  %v387_v15 = vsel %vm375_vm6, %v369_v63, %v386_v11  ;;  %v380_v18 = vsel %vm374_vm5, %v377_v1, %v379_v5  ;;  %v154_v22 = vshrl.u32 %v2339_v46, %v148_v62 }
  0xef   :  { %v384_v20 = vsel %vm374_vm5, %v381_v3, %v383_v14  ;;  %v388_v21 = vsel %vm374_vm5, %v385_v4, %v387_v15  ;;  %v152_v29 = vor.u32 %v151_v16, %v150_v13  ;;  %v156_v33 = vshll.u32 %v2339_v46, %v147_v43 }
  0xf0   :  { %v2447_v23 = vmul.u32.u64.low %v2415_v35, %v388_v21  ;;  %v2448_v24 = vmul.u32.u64.high %v2415_v35, %v388_v21, %v2447_v23  ;;  %v2451_v25 = vmul.u32.u64.low %v2415_v35, %v384_v20  ;;  %v2452_v26 = vmul.u32.u64.high %v2415_v35, %v384_v20, %v2451_v25 }
  0xf1   :  { %v155_v32 = vor.u32 %v154_v22, %v153_v17  ;;  %v157_v39 = vshrl.u32 %v2340_v48, %v148_v62  ;;  %v149_v31 = vshrl.u32 %v3879_v40, %v148_v62  ;;  %v159_v41 = vshll.u32 %v2340_v48, %v147_v43 }
  0xf2   :  { %v160_v45 = vshrl.u32 %v3881_v50, %v148_v62  ;;  %v163_v47 = vshrl.u32 %v3872_v57, %v148_v62  ;;  %v396_v49 = vmul.u32 %v2415_v35, %v380_v18  ;;  %v162_v52 = vshll.u32 %v3881_v50, %v147_v43 }
  0xf3   :  { %v158_v51 = vor.u32 %v157_v39, %v156_v33  ;;  %vm165_vm9 = vcmp.lt.s32.totalorder %v2423_v42, 1  ;;  %vm398_vm10 = vc.u32 %v2448_v24, %v2451_v25  ;;  %v399_v53 = vadd.s32 1, %v2452_v26 }
  0xf4   :  { %v161_v54 = vor.u32 %v160_v45, %v159_v41  ;;  %vm166_vm11 = vcmp.lt.s32.totalorder %v2423_v42, 2  ;;  %v164_v55 = vor.u32 %v163_v47, %v162_v52  ;;  %vm167_vm12 = vcmp.lt.s32.totalorder %v2423_v42, 3 }
  0xf5   :  { %vm168_vm13 = vcmp.lt.s32.totalorder %v2423_v42, 4  ;;  %v173_v56 = vsel %vm165_vm9, %v152_v29, %v155_v32  ;;  %v400_v35 = vsel %vm398_vm10, %v399_v53, %v2452_v26  ;;  %v177_v59 = vsel %vm165_vm9, %v155_v32, %v158_v51 }
  0xf6   :  { %v170_v58 = vsel %vm168_vm13, %v158_v51, 2102212464  ;;  %v174_v43 = vsel %vm168_vm13, %v161_v54, 920167782  ;;  %v401_v60 = vadd.s32 %v400_v35, %v396_v49  ;;  %v169_v61 = vsel %vm165_vm9, %v149_v31, %v152_v29 }
  0xf7   :  { %v175_v62 = vsel %vm167_vm12, %v158_v51, %v174_v43  ;;  %v178_v63 = vsel %vm168_vm13, %v164_v55, 1326507024  ;;  %v171_v0 = vsel %vm167_vm12, %v155_v32, %v170_v58  ;;  %v457_v3 = vsel %vm456_vm8, %v2420_v38, 0 }
  0xf8   :  { %v176_v1 = vsel %vm166_vm11, %v173_v56, %v175_v62  ;;  %v179_v2 = vsel %vm167_vm12, %v161_v54, %v178_v63  ;;  %v402_v4 = vadd.s32 536870912, %v401_v60  ;;  %v452_v15 = vand.u32 8388607, %v445_v37 }
  0xf9   :  { %v180_v5 = vsel %vm166_vm11, %v177_v59, %v179_v2  ;;  %v2479_v8 = vmul.u32.u64.low %v2417_v36, %v176_v1  ;;  %v2480_v11 = vmul.u32.u64.high %v2417_v36, %v176_v1, %v2479_v8  ;;  %v172_v38 = vsel %vm166_vm11, %v169_v61, %v171_v0 }
  0xfa   :  { %v2484_v13 = vmul.u32.u64.low %v2417_v36, %v180_v5  ;;  %v2485_v14 = vmul.u32.u64.high %v2417_v36, %v180_v5, %v2484_v13  ;;  %v2489_v16 = vshrl.u32 %v402_v4, 30  ;;  %v459_v17 = vand.u32 31, %v457_v3 }
  0xfb   :  { %v240_v18 = vand.u32 2139095040, %v2405_v19  ;;  %v191_v21 = vadd.s32 1, %v2480_v11  ;;  %v188_v23 = vmul.u32 %v2417_v36, %v172_v38  ;;  %v453_v26 = vor.u32 8388608, %v452_v15 }
  0xfc   :  { %v404_v20 = vshll.u32 %v2489_v16, 30  ;;  %v460_v22 = vsub.s32 32, %v459_v17  ;;  %vm190_vm14 = vc.u32 %v2485_v14, %v2479_v8  ;;  %v462_v42 = vshll.u32 %v3879_v40, %v459_v17 }
  0xfd   :  { %v192_v32 = vsel %vm190_vm14, %v191_v21, %v2480_v11  ;;  %v241_v33 = vshrl.u32 %v240_v18, 23  ;;  %v465_v41 = vshll.u32 %v2338_v44, %v459_v17  ;;  %v458_v47 = vshrl.u32 %v457_v3, 5 }
  0xfe   :  { %v2499_v29 = vsub.s32 %v401_v60, %v404_v20  ;;  %v193_v39 = vadd.s32 %v192_v32, %v188_v23  ;;  %v463_v31 = vshrl.u32 %v2338_v44, %v460_v22  ;;  %v466_v45 = vshrl.u32 %v2339_v46, %v460_v22 }
  0xff   :  { %v468_v49 = vshll.u32 %v2339_v46, %v459_v17  ;;  %v469_v51 = vshrl.u32 %v2340_v48, %v460_v22  ;;  %v471_v35 = vshll.u32 %v2340_v48, %v459_v17  ;;  %v472_v58 = vshrl.u32 %v3881_v50, %v460_v22 }
 0x100   :  { %v407_v36 = vsub.s32 0, %v2499_v29  ;;  %v194_v52 = vadd.s32 536870912, %v193_v39  ;;  %v464_v53 = vor.u32 %v463_v31, %v462_v42  ;;  %v467_v54 = vor.u32 %v466_v45, %v465_v41 }
 0x101   :  { %v470_v56 = vor.u32 %v469_v51, %v468_v49  ;;  %v474_v59 = vshll.u32 %v3881_v50, %v459_v17  ;;  %v475_v60 = vshrl.u32 %v3872_v57, %v460_v22  ;;  %v493_v61 = vshll.u32 %v453_v26, 8 }
 0x102   :  { %v2056_v55 = vmin.u32 %v407_v36, %v2499_v29  ;;  %v2512_v43 = vshrl.u32 %v194_v52, 30  ;;  %v473_v63 = vor.u32 %v472_v58, %v471_v35  ;;  %vm477_vm15 = vcmp.lt.s32.totalorder %v458_v47, 1 }
 0x103   :  { %v2051_v0 = vadd.s32 4294967169, %v241_v33  ;;  %v476_v2 = vor.u32 %v475_v60, %v474_v59  ;;  %vm479_vm0 = vcmp.lt.s32.totalorder %v458_v47, 3  ;;  %vm480_vm1 = vcmp.lt.s32.totalorder %v458_v47, 4 }
 0x104   :  { %v409_v62 = vclz %v2056_v55  ;;  %v196_v1 = vshll.u32 %v2512_v43, 30  ;;  %v485_v4 = vsel %vm477_vm15, %v464_v53, %v467_v54  ;;  %v486_v5 = vsel %vm480_vm1, %v473_v63, 920167782 }
 0x105   :  { %v489_v11 = vsel %vm477_vm15, %v467_v54, %v470_v56  ;;  %vm478_vm2 = vcmp.lt.s32.totalorder %v458_v47, 2  ;;  %v487_v15 = vsel %vm479_vm0, %v470_v56, %v486_v5  ;;  %v490_v38 = vsel %vm480_vm1, %v476_v2, 1326507024 }
 0x106   :  { %v2057_v3 = vadd.s32 4294967294, %v409_v62  ;;  %v2519_v13 = vsub.s32 %v193_v39, %v196_v1  ;;  %v461_v17 = vshrl.u32 %v3879_v40, %v460_v22  ;;  %v482_v18 = vsel %vm480_vm1, %v470_v56, 2102212464 }
 0x107   :  { %v491_v20 = vsel %vm479_vm0, %v473_v63, %v490_v38  ;;  %v488_v26 = vsel %vm478_vm2, %v485_v4, %v487_v15  ;;  %v483_v31 = vsel %vm479_vm0, %v467_v54, %v482_v18  ;;  %v247_v52 = vadd.s32 1, %v2051_v0 }
 0x108   :  { %vm2058_vm3 = vcmp.lt.s32.totalorder %v2057_v3, 0  ;;  %v199_v23 = vsub.s32 0, %v2519_v13  ;;  %v492_v32 = vsel %vm478_vm2, %v489_v11, %v491_v20  ;;  %v481_v33 = vsel %vm477_vm15, %v461_v17, %v464_v53 }
 0x109   :  { %v412_v21 = vsel %vm2058_vm3, 0, %v2057_v3  ;;  %v2530_v41 = vmul.u32.u64.low %v493_v61, %v492_v32  ;;  %v2531_v45 = vmul.u32.u64.high %v493_v61, %v492_v32, %v2530_v41  ;;  %v397_v55 = vadd.s32 %v2451_v25, %v2448_v24 }
 0x10a   :  { %v417_v42 = vsub.s32 4294967266, %v412_v21  ;;  %v2048_v39 = vmin.u32 %v199_v23, %v2519_v13  ;;  %v413_v22 = vsub.s32 32, %v412_v21  ;;  %v484_v53 = vsel %vm478_vm2, %v481_v33, %v483_v31 }
 0x10b   :  { %v2533_v36 = vmul.u32.u64.low %v493_v61, %v488_v26  ;;  %v2534_v49 = vmul.u32.u64.high %v493_v61, %v488_v26, %v2533_v36  ;;  %v237_v35 = vand.u32 2147483647, %v2405_v19  ;;  %vm248_vm5 = vcmp.gt.s32.totalorder %v247_v52, 0 }
 0x10c   :  { %v201_v51 = vclz %v2048_v39  ;;  %v418_v56 = vadd.s32 127, %v417_v42  ;;  %v415_v54 = vshrl.u32 %v397_v55, %v413_v22  ;;  %v249_v60 = vsel %vm248_vm5, %v247_v52, 0 }
 0x10d   :  { %vm502_vm4 = vc.u32 %v2531_v45, %v2533_v36  ;;  %v503_v59 = vadd.s32 1, %v2534_v49  ;;  %v500_v62 = vmul.u32 %v493_v61, %v484_v53  ;;  %v251_v63 = vand.u32 31, %v249_v60 }
 0x10e   :  { %v2049_v58 = vadd.s32 4294967294, %v201_v51  ;;  %v414_v0 = vshll.u32 %v2499_v29, %v412_v21  ;;  %v419_v24 = vshll.u32 %v418_v56, 23  ;;  %v244_v47 = vand.u32 8388607, %v237_v35 }
 0x10f   :  { %v504_v25 = vsel %vm502_vm4, %v503_v59, %v2534_v49  ;;  %v252_v4 = vsub.s32 32, %v251_v63  ;;  %vm343_vm7 = vcmp.lt.s32.totalorder %v2390_v6, 0  ;;  %v427_v20 = vsub.s32 4, %v2489_v16 }
 0x110   :  { %vm2050_vm6 = vcmp.lt.s32.totalorder %v2049_v58, 0  ;;  %v505_v1 = vadd.s32 %v504_v25, %v500_v62  ;;  %v416_v2 = vor.u32 %v415_v54, %v414_v0  ;;  %v420_v11 = vor.u32 4788187, %v419_v24 }
 0x111   :  { %v2548_v3 = vsel %vm2050_vm6, 0, %v2049_v58  ;;  %v245_v15 = vor.u32 8388608, %v244_v47  ;;  %v255_v29 = vshrl.u32 %v2338_v44, %v252_v4  ;;  %v258_v17 = vshrl.u32 %v2339_v46, %v252_v4 }
 0x112   :  { %v506_v5 = vadd.s32 536870912, %v505_v1  ;;  %v209_v61 = vsub.s32 4294967266, %v2548_v3  ;;  %v423_v18 = vcvt.s32.f32 %v416_v2  ;;  %v189_v21 = vadd.s32 %v2479_v8, %v2485_v14 }
 0x113   :  { %v261_v23 = vshrl.u32 %v2340_v48, %v252_v4  ;;  %v250_v32 = vshrl.u32 %v249_v60, 5  ;;  %v254_v42 = vshll.u32 %v3879_v40, %v251_v63  ;;  %v257_v33 = vshll.u32 %v2338_v44, %v251_v63 }
 0x114   :  { %v2552_v38 = vshrl.u32 %v506_v5, 30  ;;  %v421_v39 = vand.u32 2147483647, %v420_v11  ;;  %v260_v31 = vshll.u32 %v2339_v46, %v251_v63  ;;  %v263_v41 = vshll.u32 %v2340_v48, %v251_v63 }
 0x115   :  { %v264_v22 = vshrl.u32 %v3881_v50, %v252_v4  ;;  %v210_v49 = vadd.s32 127, %v209_v61  ;;  %v256_v8 = vor.u32 %v255_v29, %v254_v42  ;;  %v259_v14 = vor.u32 %v258_v17, %v257_v33 }
 0x116   :  { %v508_v26 = vshll.u32 %v2552_v38, 30  ;;  %v262_v52 = vor.u32 %v261_v23, %v260_v31  ;;  %v266_v56 = vshll.u32 %v3881_v50, %v251_v63  ;;  %v267_v53 = vshrl.u32 %v3872_v57, %v252_v4 }
 0x117   :  { %v265_v55 = vor.u32 %v264_v22, %v263_v41  ;;  %v428_v58 = vsel %vm343_vm7, %v427_v20, %v2489_v16  ;;  %v285_v59 = vshll.u32 %v245_v15, 8  ;;  %v760_v60 = vand.u32 2139095040, %v2407_v27 }
 0x118   :  { %v2566_v51 = vsub.s32 %v505_v1, %v508_v26  ;;  %v424_v62 = vmul.f32 %v423_v18, %v421_v39  ;;  %v205_v0 = vsub.s32 32, %v2548_v3  ;;  %v206_v24 = vshll.u32 %v2519_v13, %v2548_v3 }
 0x119   :  { %v268_v25 = vor.u32 %v267_v53, %v266_v56  ;;  %v211_v47 = vshll.u32 %v210_v49, 23  ;;  %vm269_vm8 = vcmp.lt.s32.totalorder %v250_v32, 1  ;;  %vm272_vm9 = vcmp.lt.s32.totalorder %v250_v32, 4 }
 0x11a   :  { %v511_v54 = vsub.s32 0, %v2566_v51  ;;  %vm271_vm10 = vcmp.lt.s32.totalorder %v250_v32, 3  ;;  %v274_v1 = vsel %vm272_vm9, %v262_v52, 2102212464  ;;  %v277_v16 = vsel %vm269_vm8, %v256_v8, %v259_v14 }
 0x11b   :  { %v278_v2 = vsel %vm272_vm9, %v265_v55, 920167782  ;;  %v253_v11 = vshrl.u32 %v3879_v40, %v252_v4  ;;  %vm270_vm11 = vcmp.lt.s32.totalorder %v250_v32, 2  ;;  %v207_v61 = vshrl.u32 %v189_v21, %v205_v0 }
 0x11c   :  { %v2060_v63 = vmin.u32 %v511_v54, %v2566_v51  ;;  %v279_v15 = vsel %vm271_vm10, %v262_v52, %v278_v2  ;;  %v281_v17 = vsel %vm269_vm8, %v259_v14, %v262_v52  ;;  %v282_v13 = vsel %vm272_vm9, %v268_v25, 1326507024 }
 0x11d   :  { %v280_v29 = vsel %vm270_vm11, %v277_v16, %v279_v15  ;;  %v273_v18 = vsel %vm269_vm8, %v253_v11, %v256_v8  ;;  %v275_v20 = vsel %vm271_vm10, %v259_v14, %v274_v1  ;;  %v283_v23 = vsel %vm271_vm10, %v265_v55, %v282_v13 }
 0x11e   :  { %v513_v5 = vclz %v2060_v63  ;;  %v212_v26 = vor.u32 4788187, %v211_v47  ;;  %v284_v42 = vsel %vm270_vm11, %v281_v17, %v283_v23  ;;  %v761_v21 = vshrl.u32 %v760_v60, 23 }
 0x11f   :  { %v2582_v33 = vmul.u32.u64.low %v285_v59, %v280_v29  ;;  %v2583_v39 = vmul.u32.u64.high %v285_v59, %v280_v29, %v2582_v33  ;;  %v2586_v4 = vmul.u32.u64.low %v285_v59, %v284_v42  ;;  %v2587_v31 = vmul.u32.u64.high %v285_v59, %v284_v42, %v2586_v4 }
 0x120   :  { %v2061_v3 = vadd.s32 4294967294, %v513_v5  ;;  %vm2591_vm13 = vcmp.le.f32.partialorder %v341_v7, 0.7853982  ;;  %v208_v22 = vor.u32 %v207_v61, %v206_v24  ;;  %v276_v49 = vsel %vm270_vm11, %v273_v18, %v275_v20 }
 0x121   :  { %v430_v8 = vsel %vm2591_vm13, 0, %v428_v58  ;;  %v2071_v52 = vadd.s32 4294967169, %v761_v21  ;;  %v425_v55 = vxor.u32 2147483648, %v424_v62  ;;  %v213_v56 = vand.u32 2147483647, %v212_v26 }
 0x122   :  { %vm2062_vm12 = vcmp.lt.s32.totalorder %v2061_v3, 0  ;;  %v219_v53 = vsub.s32 4, %v2512_v43  ;;  %v295_v54 = vadd.s32 1, %v2583_v39  ;;  %v292_v60 = vmul.u32 %v285_v59, %v276_v49 }
 0x123   :  { %v516_v14 = vsel %vm2062_vm12, 0, %v2061_v3  ;;  %vm294_vm14 = vc.u32 %v2587_v31, %v2582_v33  ;;  %v757_v7 = vand.u32 2147483647, %v2407_v27  ;;  %v215_v0 = vcvt.s32.f32 %v208_v22 }
 0x124   :  { %v521_v32 = vsub.s32 4294967266, %v516_v14  ;;  %v296_v24 = vsel %vm294_vm14, %v295_v54, %v2583_v39  ;;  %v767_v25 = vadd.s32 1, %v2071_v52  ;;  %v434_v58 = vadd.s32 3, %v430_v8 }
 0x125   :  { %vm135_vm15 = vcmp.lt.s32.totalorder %v2394_v9, 0  ;;  %v297_v47 = vadd.s32 %v296_v24, %v292_v60  ;;  %v426_v63 = vsel %vm343_vm7, %v425_v55, %v424_v62  ;;  %v2607_v1 = vmul.f32 %v215_v0, %v213_v56 }
 0x126   :  { %v2612_v59 = vsel %vm135_vm15, %v219_v53, %v2512_v43  ;;  %vm768_vm0 = vcmp.gt.s32.totalorder %v767_v25, 0  ;;  %v517_v16 = vsub.s32 32, %v516_v14  ;;  %v764_v5 = vand.u32 8388607, %v757_v7 }
 0x127   :  { %v298_v2 = vadd.s32 536870912, %v297_v47  ;;  %v769_v11 = vsel %vm768_vm0, %v767_v25, 0  ;;  %vm2618_vm1 = vcmp.le.f32.partialorder %v133_v10, 0.7853982  ;;  %v522_v62 = vadd.s32 127, %v521_v32 }
 0x128   :  { %v771_v61 = vand.u32 31, %v769_v11  ;;  %v2622_v29 = vand.u32 3, %v434_v58  ;;  %v222_v43 = vsel %vm2618_vm1, 0, %v2612_v59  ;;  %v501_v17 = vadd.s32 %v2533_v36, %v2531_v45 }
 0x129   :  { %v2629_v13 = vshrl.u32 %v298_v2, 30  ;;  %v2634_v10 = vsel %vm2591_vm13, %v2390_v6, %v426_v63  ;;  %v531_v3 = vsub.s32 4, %v2552_v38  ;;  %v552_v20 = vand.u32 2139095040, %v2409_v28 }
 0x12a   :  { %v772_v18 = vsub.s32 32, %v771_v61  ;;  %v217_v23 = vxor.u32 2147483648, %v2607_v1  ;;  %v519_v26 = vshrl.u32 %v501_v17, %v517_v16  ;;  %v765_v39 = vor.u32 8388608, %v764_v5 }
 0x12b   :  { %v300_v42 = vshll.u32 %v2629_v13, 30  ;;  %v523_v4 = vshll.u32 %v522_v62, 23  ;;  %v774_v22 = vshll.u32 %v3879_v40, %v771_v61  ;;  %v777_v49 = vshll.u32 %v2338_v44, %v771_v61 }
 0x12c   :  { %v775_v45 = vshrl.u32 %v2338_v44, %v772_v18  ;;  %v778_v36 = vshrl.u32 %v2339_v46, %v772_v18  ;;  %v781_v21 = vshrl.u32 %v2340_v48, %v772_v18  ;;  %v784_v8 = vshrl.u32 %v3881_v50, %v772_v18 }
 0x12d   :  { %v2643_v41 = vsub.s32 %v297_v47, %v300_v42  ;;  %v770_v52 = vshrl.u32 %v769_v11, 5  ;;  %v780_v55 = vshll.u32 %v2339_v46, %v771_v61  ;;  %v783_v56 = vshll.u32 %v2340_v48, %v771_v61 }
 0x12e   :  { %v553_v53 = vshrl.u32 %v552_v20, 23  ;;  %vm447_vm2 = vcmp.lt.s32.totalorder %v2398_v12, 0  ;;  %v518_v54 = vshll.u32 %v2566_v51, %v516_v14  ;;  %v776_v0 = vor.u32 %v775_v45, %v774_v22 }
 0x12f   :  { %v303_v60 = vsub.s32 0, %v2643_v41  ;;  %v779_v32 = vor.u32 %v778_v36, %v777_v49  ;;  %v782_v24 = vor.u32 %v781_v21, %v780_v55  ;;  %v785_v25 = vor.u32 %v784_v8, %v783_v56 }
 0x130   :  { %v786_v58 = vshll.u32 %v3881_v50, %v771_v61  ;;  %v787_v47 = vshrl.u32 %v3872_v57, %v772_v18  ;;  %v520_v63 = vor.u32 %v519_v26, %v518_v54  ;;  %v524_v16 = vor.u32 4788187, %v523_v4 }
 0x131   :  { %v2052_v2 = vmin.u32 %v303_v60, %v2643_v41  ;;  %v805_v5 = vshll.u32 %v765_v39, 8  ;;  %vm2658_vm3 = vcmp.le.f32.partialorder %v445_v37, 0.7853982  ;;  %v773_v51 = vshrl.u32 %v3879_v40, %v772_v18 }
 0x132   :  { %v788_v14 = vor.u32 %v787_v47, %v786_v58  ;;  %vm789_vm4 = vcmp.lt.s32.totalorder %v770_v52, 1  ;;  %v2063_v62 = vadd.s32 4294967169, %v553_v53  ;;  %vm791_vm5 = vcmp.lt.s32.totalorder %v770_v52, 3 }
 0x133   :  { %v305_v17 = vclz %v2052_v2  ;;  %vm792_vm6 = vcmp.lt.s32.totalorder %v770_v52, 4  ;;  %v797_v61 = vsel %vm789_vm4, %v776_v0, %v779_v32  ;;  %v801_v42 = vsel %vm789_vm4, %v779_v32, %v782_v24 }
 0x134   :  { %v794_v20 = vsel %vm792_vm6, %v782_v24, 2102212464  ;;  %v798_v26 = vsel %vm792_vm6, %v785_v25, 920167782  ;;  %v802_v4 = vsel %vm792_vm6, %v788_v14, 1326507024  ;;  %v793_v36 = vsel %vm789_vm4, %v773_v51, %v776_v0 }
 0x135   :  { %v2053_v39 = vadd.s32 4294967294, %v305_v17  ;;  %vm790_vm7 = vcmp.lt.s32.totalorder %v770_v52, 2  ;;  %v799_v37 = vsel %vm791_vm5, %v782_v24, %v798_v26  ;;  %v803_v45 = vsel %vm791_vm5, %v785_v25, %v802_v4 }
 0x136   :  { %v800_v18 = vsel %vm790_vm7, %v797_v61, %v799_v37  ;;  %v804_v21 = vsel %vm790_vm7, %v801_v42, %v803_v45  ;;  %v559_v22 = vadd.s32 1, %v2063_v62  ;;  %v795_v49 = vsel %vm791_vm5, %v779_v32, %v794_v20 }
 0x137   :  { %vm2054_vm8 = vcmp.lt.s32.totalorder %v2053_v39, 0  ;;  %v2668_v8 = vmul.u32.u64.low %v805_v5, %v804_v21  ;;  %v2669_v55 = vmul.u32.u64.high %v805_v5, %v804_v21, %v2668_v8  ;;  %v2674_v56 = vsel %vm447_vm2, %v531_v3, %v2552_v38 }
 0x138   :  { %v2676_v53 = vmul.u32.u64.low %v805_v5, %v800_v18  ;;  %v2677_v54 = vmul.u32.u64.high %v805_v5, %v800_v18, %v2676_v53  ;;  %vm560_vm9 = vcmp.gt.s32.totalorder %v559_v22, 0  ;;  %v218_v60 = vsel %vm135_vm15, %v217_v23, %v2607_v1 }
 0x139   :  { %v525_v0 = vand.u32 2147483647, %v524_v16  ;;  %v3871_v32 = vand.u32 2147483647, %v2409_v28  ;;  %v561_v24 = vsel %vm560_vm9, %v559_v22, 0  ;;  %v2688_v25 = vadd.s32 3, %v222_v43 }
 0x13a   :  { %v2690_v38 = vsel %vm2054_vm8, 0, %v2053_v39  ;;  %v796_v3 = vsel %vm790_vm7, %v793_v36, %v795_v49  ;;  %v563_v58 = vand.u32 31, %v561_v24  ;;  %2249 = vcosq.f32 %v2634_v10 }
 0x13b   :  { %v527_v47 = vcvt.s32.f32 %v520_v63  ;;  %v534_v1 = vsel %vm2658_vm3, 0, %v2674_v56  ;;  %vm814_vm10 = vc.u32 %v2669_v55, %v2676_v53  ;;  %v2702_v59 = vsel %vm2618_vm1, %v2394_v9, %v218_v60 }
 0x13c   :  { %v293_v43 = vadd.s32 %v2582_v33, %v2587_v31  ;;  %v815_v23 = vadd.s32 1, %v2677_v54  ;;  %v564_v52 = vsub.s32 32, %v563_v58  ;;  %v313_v63 = vsub.s32 4294967266, %v2690_v38 }
 0x13d   :  { %v2707_v16 = vmul.f32 %v527_v47, %v525_v0  ;;  %v812_v2 = vmul.u32 %v805_v5, %v796_v3  ;;  %v556_v51 = vand.u32 8388607, %v3871_v32  ;;  %v566_v15 = vshll.u32 %v3879_v40, %v563_v58 }
 0x13e   :  { %v816_v14 = vsel %vm814_vm10, %v815_v23, %v2677_v54  ;;  %v567_v62 = vshrl.u32 %v2338_v44, %v564_v52  ;;  %v570_v17 = vshrl.u32 %v2339_v46, %v564_v52  ;;  %v562_v31 = vshrl.u32 %v561_v24, 5 }
 0x13f   :  { %v817_v33 = vadd.s32 %v816_v14, %v812_v2  ;;  %v569_v61 = vshll.u32 %v2338_v44, %v563_v58  ;;  %v573_v20 = vshrl.u32 %v2340_v48, %v564_v52  ;;  %v572_v5 = vshll.u32 %v2339_v46, %v563_v58 }
 0x140   :  { %v568_v26 = vor.u32 %v567_v62, %v566_v15  ;;  %v575_v42 = vshll.u32 %v2340_v48, %v563_v58  ;;  %v576_v4 = vshrl.u32 %v3881_v50, %v564_v52  ;;  %v578_v45 = vshll.u32 %v3881_v50, %v563_v58 }
 0x141   :  { %v818_v39 = vadd.s32 536870912, %v817_v33  ;;  %v571_v37 = vor.u32 %v570_v17, %v569_v61  ;;  %v579_v36 = vshrl.u32 %v3872_v57, %v564_v52  ;;  %v314_v18 = vadd.s32 127, %v313_v63 }
 0x142   :  { %v557_v21 = vor.u32 8388608, %v556_v51  ;;  %v574_v22 = vor.u32 %v573_v20, %v572_v5  ;;  %v577_v49 = vor.u32 %v576_v4, %v575_v42  ;;  %v323_v8 = vsub.s32 4, %v2629_v13 }
 0x143   :  { %v2724_v54 = vshrl.u32 %v818_v39, 30  ;;  %v580_v60 = vor.u32 %v579_v36, %v578_v45  ;;  %vm584_vm11 = vcmp.lt.s32.totalorder %v562_v31, 4  ;;  %v529_v0 = vxor.u32 2147483648, %v2707_v16 }
 0x144   :  { %vm239_vm12 = vcmp.lt.s32.totalorder %v2405_v19, 0  ;;  %v309_v24 = vsub.s32 32, %v2690_v38  ;;  %vm581_vm13 = vcmp.lt.s32.totalorder %v562_v31, 1  ;;  %v590_v3 = vsel %vm584_vm11, %v577_v49, 920167782  ;;  %v2730_v58 = vpop.eup %2249 }
 0x145   :  { %v820_v47 = vshll.u32 %v2724_v54, 30  ;;  %vm583_vm14 = vcmp.lt.s32.totalorder %v562_v31, 3  ;;  %v589_v23 = vsel %vm581_vm13, %v568_v26, %v571_v37  ;;  %v864_v63 = vand.u32 2139095040, %v2411_v30 }
 0x146   :  { %v315_v2 = vshll.u32 %v314_v18, 23  ;;  %v591_v51 = vsel %vm583_vm14, %v574_v22, %v590_v3  ;;  %v593_v14 = vsel %vm581_vm13, %v571_v37, %v574_v22  ;;  %v594_v15 = vsel %vm584_vm11, %v580_v60, 1326507024 }
 0x147   :  { %vm2740_vm15 = vcmp.le.f32.partialorder %v237_v35, 0.7853982  ;;  %v2744_v17 = vsub.s32 %v817_v33, %v820_v47  ;;  %v565_v61 = vshrl.u32 %v3879_v40, %v564_v52  ;;  %vm582_vm0 = vcmp.lt.s32.totalorder %v562_v31, 2 }
 0x148   :  { %v586_v20 = vsel %vm584_vm11, %v574_v22, 2102212464  ;;  %v310_v5 = vshll.u32 %v2643_v41, %v2690_v38  ;;  %v592_v42 = vsel %vm582_vm0, %v589_v23, %v591_v51  ;;  %v595_v4 = vsel %vm583_vm14, %v577_v49, %v594_v15 }
 0x149   :  { %v597_v39 = vshll.u32 %v557_v21, 8  ;;  %v311_v45 = vshrl.u32 %v293_v43, %v309_v24  ;;  %v823_v35 = vsub.s32 0, %v2744_v17  ;;  %v585_v36 = vsel %vm581_vm13, %v565_v61, %v568_v26 }
 0x14a   :  { %v596_v33 = vsel %vm582_vm0, %v593_v14, %v595_v4  ;;  %v587_v52 = vsel %vm583_vm14, %v571_v37, %v586_v20  ;;  %v865_v22 = vshrl.u32 %v864_v63, 23  ;;  %v316_v3 = vor.u32 4788187, %v315_v2 }
 0x14b   :  { %v2756_v18 = vmul.u32.u64.low %v597_v39, %v596_v33  ;;  %v2757_v60 = vmul.u32.u64.high %v597_v39, %v596_v33, %v2756_v18  ;;  %v2072_v41 = vmin.u32 %v823_v35, %v2744_v17  ;;  %2251 = vsinq.f32 %v2634_v10 }
 0x14c   :  { %v2760_v38 = vmul.u32.u64.low %v597_v39, %v592_v42  ;;  %v2761_v47 = vmul.u32.u64.high %v597_v39, %v592_v42, %v2760_v38  ;;  %v2766_v43 = vand.u32 3, %v2688_v25  ;;  %v861_v26 = vand.u32 2147483647, %v2411_v30 }
 0x14d   :  { %v2075_v21 = vadd.s32 4294967169, %v865_v22  ;;  %v312_v37 = vor.u32 %v311_v45, %v310_v5  ;;  %v2772_v49 = vsel %vm239_vm12, %v323_v8, %v2629_v13  ;;  %v825_v24 = vclz %v2072_v41 }
 0x14e   :  { %v588_v23 = vsel %vm582_vm0, %v585_v36, %v587_v52  ;;  %2253 = vsinq.f32 %v2702_v59  ;;  %v2780_v10 = vadd.s32 3, %v534_v1  ;;  %vm606_vm1 = vc.u32 %v2757_v60, %v2760_v38 }
 0x14f   :  { %v871_v25 = vadd.s32 1, %v2075_v21  ;;  %v530_v13 = vsel %vm447_vm2, %v529_v0, %v2707_v16  ;;  %v317_v8 = vand.u32 2147483647, %v316_v3  ;;  %v2073_v63 = vadd.s32 4294967294, %v825_v24 }
 0x150   :  { %v607_v31 = vadd.s32 1, %v2761_v47  ;;  %v326_v2 = vsel %vm2740_vm15, 0, %v2772_v49  ;;  %v604_v51 = vmul.u32 %v597_v39, %v588_v23  ;;  %v868_v56 = vand.u32 8388607, %v861_v26 }
 0x151   :  { %vm872_vm4 = vcmp.gt.s32.totalorder %v871_v25, 0  ;;  %v319_v1 = vcvt.s32.f32 %v312_v37  ;;  %vm2074_vm5 = vcmp.lt.s32.totalorder %v2073_v63, 0  ;;  %v2797_v16 = vsel %vm2658_vm3, %v2398_v12, %v530_v13 }
 0x152   :  { %v608_v14 = vsel %vm606_vm1, %v607_v31, %v2761_v47  ;;  %v873_v15 = vsel %vm872_vm4, %v871_v25, 0  ;;  %v828_v0 = vsel %vm2074_vm5, 0, %v2073_v63  ;;  %v813_v42 = vadd.s32 %v2676_v53, %v2669_v55 }
 0x153   :  { %v609_v61 = vadd.s32 %v608_v14, %v604_v51  ;;  %v875_v20 = vand.u32 31, %v873_v15  ;;  %v2799_v5 = vmul.f32 %v319_v1, %v317_v8  ;;  %v829_v4 = vsub.s32 32, %v828_v0 }
 0x154   :  { %v833_v39 = vsub.s32 4294967266, %v828_v0  ;;  %v869_v35 = vor.u32 8388608, %v868_v56  ;;  %v656_v33 = vand.u32 2139095040, %v2413_v34  ;;  %v830_v52 = vshll.u32 %v2744_v17, %v828_v0 }
 0x155   :  { %v610_v45 = vadd.s32 536870912, %v609_v61  ;;  %v876_v36 = vsub.s32 32, %v875_v20  ;;  %v831_v11 = vshrl.u32 %v813_v42, %v829_v4  ;;  %v878_v22 = vshll.u32 %v3879_v40, %v875_v20  ;;  %v2806_v3 = vpop.eup %2251 }
 0x156   :  { %v834_v18 = vadd.s32 127, %v833_v39  ;;  %v881_v55 = vshll.u32 %v2338_v44, %v875_v20  ;;  %v884_v37 = vshll.u32 %v2339_v46, %v875_v20  ;;  %v874_v8 = vshrl.u32 %v873_v15, 5 }
 0x157   :  { %v2808_v41 = vshrl.u32 %v610_v45, 30  ;;  %v879_v47 = vshrl.u32 %v2338_v44, %v876_v36  ;;  %v882_v53 = vshrl.u32 %v2339_v46, %v876_v36  ;;  %v885_v24 = vshrl.u32 %v2340_v48, %v876_v36 }
 0x158   :  { %v835_v21 = vshll.u32 %v834_v18, 23  ;;  %v888_v17 = vshrl.u32 %v3881_v50, %v876_v36  ;;  %v2816_v23 = vpop.eup %2253  ;;  %v832_v25 = vor.u32 %v831_v11, %v830_v52  ;;  %v887_v63 = vshll.u32 %v2340_v48, %v875_v20 }
 0x159   :  { %v612_v13 = vshll.u32 %v2808_v41, 30  ;;  %v880_v51 = vor.u32 %v879_v47, %v878_v22  ;;  %v883_v56 = vor.u32 %v882_v53, %v881_v55  ;;  %v886_v1 = vor.u32 %v885_v24, %v884_v37 }
 0x15a   :  { %v836_v31 = vor.u32 4788187, %v835_v21  ;;  %v889_v0 = vor.u32 %v888_v17, %v887_v63  ;;  %v890_v42 = vshll.u32 %v3881_v50, %v875_v20  ;;  %v891_v4 = vshrl.u32 %v3872_v57, %v876_v36 }
 0x15b   :  { %v2820_v14 = vsub.s32 %v609_v61, %v612_v13  ;;  %v321_v39 = vxor.u32 2147483648, %v2799_v5  ;;  %v909_v52 = vshll.u32 %v869_v35, 8  ;;  %v657_v11 = vshrl.u32 %v656_v33, 23 }
 0x15c   :  { %v837_v45 = vand.u32 2147483647, %v836_v31  ;;  %v839_v18 = vcvt.s32.f32 %v832_v25  ;;  %v892_v32 = vor.u32 %v891_v4, %v890_v42  ;;  %vm893_vm2 = vcmp.lt.s32.totalorder %v874_v8, 1 }
 0x15d   :  { %v615_v15 = vsub.s32 0, %v2820_v14  ;;  %vm759_vm3 = vcmp.lt.s32.totalorder %v2407_v27, 0  ;;  %v877_v61 = vshrl.u32 %v3879_v40, %v876_v36  ;;  %vm895_vm6 = vcmp.lt.s32.totalorder %v874_v8, 3 }
 0x15e   :  { %vm896_vm7 = vcmp.lt.s32.totalorder %v874_v8, 4  ;;  %v901_v22 = vsel %vm893_vm2, %v880_v51, %v883_v56  ;;  %v840_v20 = vmul.f32 %v839_v18, %v837_v45  ;;  %vm894_vm8 = vcmp.lt.s32.totalorder %v874_v8, 2 }
 0x15f   :  { %v2064_v47 = vmin.u32 %v615_v15, %v2820_v14  ;;  %v898_v55 = vsel %vm896_vm7, %v886_v1, 2102212464  ;;  %v902_v53 = vsel %vm896_vm7, %v889_v0, 920167782  ;;  %v905_v33 = vsel %vm893_vm2, %v883_v56, %v886_v1 }
 0x160   :  { %v903_v35 = vsel %vm895_vm6, %v886_v1, %v902_v53  ;;  %v2067_v21 = vadd.s32 4294967169, %v657_v11  ;;  %v897_v24 = vsel %vm893_vm2, %v877_v61, %v880_v51  ;;  %v906_v25 = vsel %vm896_vm7, %v892_v32, 1326507024 }
 0x161   :  { %v617_v37 = vclz %v2064_v47  ;;  %v904_v17 = vsel %vm894_vm8, %v901_v22, %v903_v35  ;;  %v899_v36 = vsel %vm895_vm6, %v883_v56, %v898_v55  ;;  %v907_v13 = vsel %vm895_vm6, %v889_v0, %v906_v25 }
 0x162   :  { %v2833_v63 = vmul.u32.u64.low %v909_v52, %v904_v17  ;;  %v2834_v31 = vmul.u32.u64.high %v909_v52, %v904_v17, %v2833_v63  ;;  %v841_v42 = vxor.u32 2147483648, %v840_v20  ;;  %v908_v45 = vsel %vm894_vm8, %v905_v33, %v907_v13 }
 0x163   :  { %v2065_v4 = vadd.s32 4294967294, %v617_v37  ;;  %v653_v1 = vand.u32 2147483647, %v2413_v34  ;;  %v322_v51 = vsel %vm239_vm12, %v321_v39, %v2799_v5  ;;  %v663_v56 = vadd.s32 1, %v2067_v21 }
 0x164   :  { %v2842_v11 = vmul.u32.u64.low %v909_v52, %v908_v45  ;;  %v2843_v32 = vmul.u32.u64.high %v909_v52, %v908_v45, %v2842_v11  ;;  %2255 = vcosq.f32 %v2702_v59  ;;  %v330_v0 = vadd.s32 3, %v326_v2 }
 0x165   :  { %vm2066_vm9 = vcmp.lt.s32.totalorder %v2065_v4, 0  ;;  %v900_v18 = vsel %vm894_vm8, %v897_v24, %v899_v36  ;;  %2257 = vcosq.f32 %v2797_v16  ;;  %vm2854_vm10 = vcmp.le.f32.partialorder %v757_v7, 0.7853982 }
 0x166   :  { %v919_v39 = vadd.s32 1, %v2834_v31  ;;  %vm664_vm11 = vcmp.gt.s32.totalorder %v663_v56, 0  ;;  %v325_v59 = vsel %vm2740_vm15, %v2405_v19, %v322_v51  ;;  %v842_v49 = vsel %vm759_vm3, %v841_v42, %v840_v20 }
 0x167   :  { %v660_v2 = vand.u32 8388607, %v653_v1  ;;  %v665_v8 = vsel %vm664_vm11, %v663_v56, 0  ;;  %v2866_v15 = vsel %vm2066_vm9, 0, %v2065_v4  ;;  %v916_v7 = vmul.u32 %v909_v52, %v900_v18 }
 0x168   :  { %vm918_vm12 = vc.u32 %v2843_v32, %v2833_v63  ;;  %v667_v61 = vand.u32 31, %v665_v8  ;;  %2259 = vsinq.f32 %v2797_v16  ;;  %v2872_v22 = vand.u32 3, %v2780_v10 }
 0x169   :  { %v2874_v62 = vand.u32 3, %v330_v0  ;;  %v920_v20 = vsel %vm918_vm12, %v919_v39, %v2834_v31  ;;  %2261 = vcosq.f32 %v325_v59  ;;  %v843_v47 = vsub.s32 4, %v2724_v54 }
 0x16a   :  { %v921_v55 = vadd.s32 %v920_v20, %v916_v7  ;;  %v668_v53 = vsub.s32 32, %v667_v61  ;;  %2263 = vsinq.f32 %v325_v59  ;;  %v845_v52 = vsel %vm2854_vm10, %v2407_v27, %v842_v49 }
 0x16b   :  { %v625_v35 = vsub.s32 4294967266, %v2866_v15  ;;  %v661_v16 = vor.u32 8388608, %v660_v2  ;;  %v670_v10 = vshll.u32 %v3879_v40, %v667_v61  ;;  %v673_v24 = vshll.u32 %v2338_v44, %v667_v61 }
 0x16c   :  { %v922_v33 = vadd.s32 536870912, %v921_v55  ;;  %v671_v21 = vshrl.u32 %v2338_v44, %v668_v53  ;;  %v674_v37 = vshrl.u32 %v2339_v46, %v668_v53  ;;  %v676_v17 = vshll.u32 %v2339_v46, %v667_v61 }
 0x16d   :  { %v677_v25 = vshrl.u32 %v2340_v48, %v668_v53  ;;  %v680_v36 = vshrl.u32 %v3881_v50, %v668_v53  ;;  %v666_v31 = vshrl.u32 %v665_v8, 5  ;;  %v679_v4 = vshll.u32 %v2340_v48, %v667_v61 }
 0x16e   :  { %v2889_v13 = vshrl.u32 %v922_v33, 30  ;;  %v672_v42 = vor.u32 %v671_v21, %v670_v10  ;;  %v2892_v45 = vpop.eup %2255  ;;  %v675_v51 = vor.u32 %v674_v37, %v673_v24  ;;  %v682_v56 = vshll.u32 %v3881_v50, %v667_v61 }
 0x16f   :  { %v678_v11 = vor.u32 %v677_v25, %v676_v17  ;;  %v683_v0 = vshrl.u32 %v3872_v57, %v668_v53  ;;  %v2896_v18 = vpop.eup %2257  ;;  %2265 = vcosq.f32 %v845_v52  ;;  %v605_v39 = vadd.s32 %v2760_v38, %v2757_v60 }
 0x170   :  { %v924_v59 = vshll.u32 %v2889_v13, 30  ;;  %v681_v49 = vor.u32 %v680_v36, %v679_v4  ;;  %2267 = vsinq.f32 %v845_v52  ;;  %v2901_v8 = vshll.u32 %v661_v16, 8 }
 0x171   :  { %v684_v2 = vor.u32 %v683_v0, %v682_v56  ;;  %vm229_vm13 = vcmp.eq.s32.totalorder %v2766_v43, 0  ;;  %v230_v7 = vxor.u32 2147483648, %v2816_v23  ;;  %vm685_vm14 = vcmp.lt.s32.totalorder %v666_v31, 1 }
 0x172   :  { %v2905_v61 = vsub.s32 %v921_v55, %v924_v59  ;;  %vm688_vm15 = vcmp.lt.s32.totalorder %v666_v31, 4  ;;  %vm232_vm0 = vcmp.eq.s32.totalorder %v2766_v43, 2  ;;  %v2908_v20 = vpop.eup %2259  ;;  %v621_v60 = vsub.s32 32, %v2866_v15 }
 0x173   :  { %v626_v38 = vadd.s32 127, %v625_v35  ;;  %v690_v52 = vsel %vm688_vm15, %v678_v11, 2102212464  ;;  %v693_v16 = vsel %vm685_vm14, %v672_v42, %v675_v51  ;;  %v2262_v33 = vpop.eup %2261  ;;  %v669_v21 = vshrl.u32 %v3879_v40, %v668_v53 }
 0x174   :  { %v927_v10 = vsub.s32 0, %v2905_v61  ;;  %vm687_vm1 = vcmp.lt.s32.totalorder %v666_v31, 3  ;;  %v694_v55 = vsel %vm688_vm15, %v681_v49, 920167782  ;;  %v2264_v37 = vpop.eup %2263  ;;  %vm686_vm4 = vcmp.lt.s32.totalorder %v666_v31, 2 }
 0x175   :  { %v695_v24 = vsel %vm687_vm1, %v678_v11, %v694_v55  ;;  %v697_v17 = vsel %vm685_vm14, %v675_v51, %v678_v11  ;;  %v698_v25 = vsel %vm688_vm15, %v684_v2, 1326507024  ;;  %vm228_vm5 = vcmp.lt.s32.totalorder %v2766_v43, 2 }
 0x176   :  { %v2076_v35 = vmin.u32 %v927_v10, %v2905_v61  ;;  %v689_v36 = vsel %vm685_vm14, %v669_v21, %v672_v42  ;;  %v691_v4 = vsel %vm687_vm1, %v675_v51, %v690_v52  ;;  %v696_v56 = vsel %vm686_vm4, %v693_v16, %v695_v24 }
 0x177   :  { %v627_v53 = vshll.u32 %v626_v38, 23  ;;  %v699_v0 = vsel %vm687_vm1, %v681_v49, %v698_v25  ;;  %v2923_v59 = vmul.u32.u64.low %v2901_v8, %v696_v56  ;;  %v2924_v57 = vmul.u32.u64.high %v2901_v8, %v696_v56, %v2923_v59 }
 0x178   :  { %vm225_vm2 = vweird.f32 %v2394_v9  ;;  %vm329_vm6 = vweird.f32 %v2405_v19  ;;  %v622_v11 = vshll.u32 %v2820_v14, %v2866_v15  ;;  %v917_v42 = vadd.s32 %v2833_v63, %v2843_v32 }
 0x179   :  { %v929_v51 = vclz %v2076_v35  ;;  %v700_v2 = vsel %vm686_vm4, %v697_v17, %v699_v0  ;;  %v692_v49 = vsel %vm686_vm4, %v689_v36, %v691_v4  ;;  %v233_v16 = vxor.u32 2147483648, %v2892_v45  ;;  %v2940_v10 = vpop.eup %2265 }
 0x17a   :  { %v2936_v38 = vmul.u32.u64.low %v2901_v8, %v700_v2  ;;  %v2937_v52 = vmul.u32.u64.high %v2901_v8, %v700_v2, %v2936_v38  ;;  %v623_v21 = vshrl.u32 %v605_v39, %v621_v60  ;;  %v231_v14 = vsel %vm229_vm13, %v2892_v45, %v230_v7  ;;  %v2945_v32 = vpop.eup %2267 }
 0x17b   :  { %v2077_v55 = vadd.s32 4294967294, %v929_v51  ;;  %v334_v63 = vxor.u32 2147483648, %v2264_v37  ;;  %v2947_v15 = vor.u32 4788187, %v627_v53  ;;  %v711_v31 = vadd.s32 1, %v2924_v57 }
 0x17c   :  { %v234_v24 = vsel %vm232_vm0, %v233_v16, %v2816_v23  ;;  %v337_v17 = vxor.u32 2147483648, %v2262_v33  ;;  %v708_v39 = vmul.u32 %v2901_v8, %v692_v49  ;;  %vm332_vm8 = vcmp.lt.s32.totalorder %v2874_v62, 2 }
 0x17d   :  { %vm2078_vm7 = vcmp.lt.s32.totalorder %v2077_v55, 0  ;;  %vm333_vm9 = vcmp.eq.s32.totalorder %v2874_v62, 0  ;;  %vm710_vm11 = vc.u32 %v2937_v52, %v2923_v59  ;;  %vm336_vm12 = vcmp.eq.s32.totalorder %v2874_v62, 2 }
 0x17e   :  { %v932_v45 = vsel %vm2078_vm7, 0, %v2077_v55  ;;  %v335_v7 = vsel %vm333_vm9, %v2262_v33, %v334_v63  ;;  %v712_v35 = vsel %vm710_vm11, %v711_v31, %v2924_v57  ;;  %v235_v23 = vsel %vm228_vm5, %v231_v14, %v234_v24 }
 0x17f   :  { %v933_v60 = vsub.s32 32, %v932_v45  ;;  %v937_v25 = vsub.s32 4294967266, %v932_v45  ;;  %v934_v8 = vshll.u32 %v2905_v61, %v932_v45  ;;  %v713_v36 = vadd.s32 %v712_v35, %v708_v39 }
 0x180   :  { %v338_v4 = vsel %vm336_vm12, %v337_v17, %v2264_v37  ;;  %v438_v56 = vxor.u32 2147483648, %v2806_v3  ;;  %vm433_vm13 = vweird.f32 %v2390_v6  ;;  %vm537_vm14 = vweird.f32 %v2398_v12 }
 0x181   :  { %v935_v33 = vshrl.u32 %v917_v42, %v933_v60  ;;  %v938_v53 = vadd.s32 127, %v937_v25  ;;  %v339_v0 = vsel %vm332_vm8, %v335_v7, %v338_v4  ;;  %v441_v57 = vxor.u32 2147483648, %v2730_v58 }
 0x182   :  { %v714_v51 = vadd.s32 536870912, %v713_v36  ;;  %v236_v43 = vsel %vm225_vm2, nan, %v235_v23  ;;  %v340_v61 = vsel %vm329_vm6, nan, %v339_v0  ;;  %vm437_vm15 = vcmp.eq.s32.totalorder %v2622_v29, 0 }
 0x183   :  { %v936_v37 = vor.u32 %v935_v33, %v934_v8  ;;  %v939_v2 = vshll.u32 %v938_v53, 23  ;;  %v973_v49 = vpack.c.bf16 %v340_v61, %v236_v43  ;;  %vm440_vm0 = vcmp.eq.s32.totalorder %v2622_v29, 2  ;;  %v977_v33 = vld [vmem:[%s3868_s3] sm:$0xff]  ;;  %v979_v53 = vld [vmem:[%s3868_s3 + $0x10] sm:$0xff] }
 0x184   :  { %v2975_v42 = vshrl.u32 %v714_v51, 30  ;;  %v439_v62 = vsel %vm437_vm15, %v2730_v58, %v438_v56  ;;  %v442_v38 = vsel %vm440_vm0, %v441_v57, %v2806_v3  ;;  %v542_v16 = vxor.u32 2147483648, %v2908_v20 }
 0x185   :  { %v624_v9 = vor.u32 %v623_v21, %v622_v11  ;;  %v629_v55 = vand.u32 2147483647, %v2947_v15  ;;  %v940_v19 = vor.u32 4788187, %v939_v2  ;;  %2142 = vmatprep.subr.bf16.mxu0 %v973_v49  ;;  %2158 = vmatprep.subr.bf16.mxu1 %v973_v49  ;;  %vm541_vm1 = vcmp.eq.s32.totalorder %v2872_v22, 0 }
 0x186   :  { %v716_v14 = vshll.u32 %v2975_v42, 30  ;;  %2143 = vmatpush3.bf16.msra.mxu0 %v973_v49  ;;  %2162 = vmatpush3.bf16.msra.mxu1 %v973_v49  ;;  %vm436_vm4 = vcmp.lt.s32.totalorder %v2622_v29, 2  ;;  %v543_v58 = vsel %vm541_vm1, %v2896_v18, %v542_v16  ;;  %v545_v3 = vxor.u32 2147483648, %v2896_v18  ;;  %v978_v16 = vld [vmem:[%s3868_s3 + $0x8] sm:$0xff] }
 0x187   :  { %v941_v63 = vand.u32 2147483647, %v940_v19  ;;  %v943_v31 = vcvt.s32.f32 %v936_v37  ;;  %v443_v11 = vsel %vm436_vm4, %v439_v62, %v442_v38  ;;  %vm544_vm5 = vcmp.eq.s32.totalorder %v2872_v22, 2 }
 0x188   :  { %v844_v21 = vsel %vm759_vm3, %v843_v47, %v2724_v54  ;;  %v2992_v15 = vsub.s32 %v713_v36, %v716_v14  ;;  %vm540_vm2 = vcmp.lt.s32.totalorder %v2872_v22, 2  ;;  %v546_v29 = vsel %vm544_vm5, %v545_v3, %v2908_v20  ;;  %v2246_v36 = vld [vmem:[%s3867_s2 + $0x10] sm:$0xff]  }
 0x189   :  { %v631_v24 = vcvt.s32.f32 %v624_v9  ;;  %v944_v17 = vmul.f32 %v943_v31, %v941_v63  ;;  %v947_v18 = vsub.s32 4, %v2889_v13  ;;  %v547_v39 = vsel %vm540_vm2, %v543_v58, %v546_v29 }
 0x18a   :  { %v719_v45 = vsub.s32 0, %v2992_v15  ;;  %v444_v7 = vsel %vm433_vm13, nan, %v443_v11  ;;  %v548_v60 = vsel %vm537_vm14, nan, %v547_v39  ;;  %v846_v54 = vsel %vm2854_vm10, 0, %v844_v21 }
 0x18b   :  { %v632_v47 = vmul.f32 %v631_v24, %v629_v55  ;;  %v945_v22 = vxor.u32 2147483648, %v944_v17  ;;  %v974_v25 = vpack.c.bf16 %v548_v60, %v444_v7  ;;  %vm863_vm3 = vcmp.lt.s32.totalorder %v2411_v30, 0  ;;  %v982_v24 = vld [vmem:[%s3868_s3 + $0x28] sm:$0xff] }
 0x18c   :  { %v2068_v20 = vmin.u32 %v719_v45, %v2992_v15  ;;  %vm3008_vm6 = vcmp.le.f32.partialorder %v861_v26, 0.7853982  ;;  %v948_v12 = vsel %vm863_vm3, %v947_v18, %v2889_v13  ;;  %v850_v5 = vadd.s32 3, %v846_v54  ;;  %v2245_v26 = vld [vmem:[%s3867_s2] sm:$0xff]  }
 0x18d   :  { %v946_v6 = vsel %vm863_vm3, %v945_v22, %v944_v17  ;;  %2144 = vmatprep.subr.bf16.mxu0 %v974_v25  ;;  %2159 = vmatprep.subr.bf16.mxu1 %v974_v25  ;;  %v633_v4 = vxor.u32 2147483648, %v632_v47  ;;  %v950_v13 = vsel %vm3008_vm6, 0, %v948_v12  ;;  %vm1045_vm10 = vcmask 523264   ;;  %v983_v22 = vld [vmem:[%s3868_s3 + $0x30] sm:$0xff] }
 0x18e   :  { %v949_v23 = vsel %vm3008_vm6, %v2411_v30, %v946_v6  ;;  %v721_v8 = vclz %v2068_v20  ;;  %2145 = vmatpush3.bf16.msra.mxu0 %v974_v25  ;;  %2163 = vmatpush3.bf16.msra.mxu1 %v974_v25  ;;  %v851_v0 = vand.u32 3, %v850_v5  ;;  %vm551_vm7 = vcmp.lt.s32.totalorder %v2409_v28, 0  ;;  %v984_v25 = vld [vmem:[%s3868_s3 + $0x38] sm:$0xff] }
 0x18f   :  { %2269 = vcosq.f32 %v949_v23  ;;  %2150 = vmatprep.mubr.msk.bf16.mxu0 %vm1045_vm10, %v2245_v26  ;;  %2154 = vmatprep.mubr.msk.bf16.mxu1 %vm1045_vm10, %v2246_v36  ;;  %v634_v57 = vsel %vm551_vm7, %v633_v4, %v632_v47  ;;  %v954_v51 = vadd.s32 3, %v950_v13  ;;  %v709_v43 = vadd.s32 %v2923_v59, %v2937_v52  ;;  %v980_v59 = vld [vmem:[%s3868_s3 + $0x18] sm:$0xff]  ;;  %v1956_v26 = vld [vmem:[%s3869_s4 + $0x8] sm:$0xff] }
 0x190   :  { %2271 = vsinq.f32 %v949_v23  ;;  %v2069_v56 = vadd.s32 4294967294, %v721_v8  ;;  %v2343_v37 = vmov 0   ;;  %v854_v62 = vxor.u32 2147483648, %v2945_v32 }
 0x191   :  { %2239 = vset.pattern.permute.xlu0 %v2343_v37  ;;  %2240 = vset.pattern.permute.xlu1 %v2343_v37  ;;  %v857_v38 = vxor.u32 2147483648, %v2940_v10  ;;  %v3895_v52 = vand.u32 2147483647, %v2409_v28  ;;  %v955_v3 = vand.u32 3, %v954_v51  ;;  %vm853_vm11 = vcmp.eq.s32.totalorder %v851_v0, 0 }
 0x192   :  { %vm2070_vm8 = vcmp.lt.s32.totalorder %v2069_v56, 0  ;;  %987 = vperm.xlu0 %2239, %v977_v33   ;;  %997 = vperm.xlu1 %2240, %v979_v53   ;;  %vm856_vm12 = vcmp.eq.s32.totalorder %v851_v0, 2  ;;  %v855_v11 = vsel %vm853_vm11, %v2940_v10, %v854_v62  ;;  %v635_v18 = vsub.s32 4, %v2808_v41  ;;  %v1961_v62 = vld [vmem:[%s3869_s4 + $0x30] sm:$0xff] }
 0x193   :  { %v724_v61 = vsel %vm2070_vm8, 0, %v2069_v56  ;;  %vm3047_vm9 = vcmp.le.f32.partialorder %v3895_v52, 0.7853982  ;;  %v858_v21 = vsel %vm856_vm12, %v857_v38, %v2945_v32  ;;  %vm852_vm13 = vcmp.lt.s32.totalorder %v851_v0, 2  ;;  %v1957_v0 = vld [vmem:[%s3869_s4 + $0x10] sm:$0xff]  ;;  %v1962_v38 = vld [vmem:[%s3869_s4 + $0x38] sm:$0xff] }
 0x194   :  { %v725_v2 = vsub.s32 32, %v724_v61  ;;  %v729_v49 = vsub.s32 4294967266, %v724_v61  ;;  %v726_v55 = vshll.u32 %v2992_v15, %v724_v61  ;;  %v637_v58 = vsel %vm3047_vm9, %v2409_v28, %v634_v57  ;;  %v981_v15 = vld [vmem:[%s3868_s3 + $0x20] sm:$0xff]  ;;  %v1960_v61 = vld [vmem:[%s3869_s4 + $0x28] sm:$0xff] }
 0x195   :  { %2273 = vcosq.f32 %v637_v58  ;;  %v859_v10 = vsel %vm852_vm13, %v855_v11, %v858_v21  ;;  %vm960_vm14 = vcmp.eq.s32.totalorder %v955_v3, 2  ;;  %vm957_vm15 = vcmp.eq.s32.totalorder %v955_v3, 0 }
 0x196   :  { %v727_v19 = vshrl.u32 %v709_v43, %v725_v2  ;;  %v730_v14 = vadd.s32 127, %v729_v49  ;;  %992 = vperm.xlu0 %2239, %v978_v16   ;;  %1002 = vperm.xlu1 %2240, %v980_v59   ;;  %vm849_vm0 = vweird.f32 %v2407_v27  ;;  %2275 = vsinq.f32 %v637_v58  ;;  %v1959_v43 = vld [vmem:[%s3869_s4 + $0x20] sm:$0xff] }
 0x197   :  { %vm956_vm1 = vcmp.lt.s32.totalorder %v955_v3, 2  ;;  %vm953_vm4 = vweird.f32 %v2411_v30  ;;  %v739_v35 = vsub.s32 4, %v2975_v42  ;;  %v636_v27 = vsel %vm551_vm7, %v635_v18, %v2808_v41  ;;  %v1955_v30 = vld [vmem:[%s3869_s4] sm:$0xff] }
 0x198   :  { %v728_v63 = vor.u32 %v727_v19, %v726_v55  ;;  %v731_v31 = vshll.u32 %v730_v14, 23  ;;  %v860_v12 = vsel %vm849_vm0, nan, %v859_v10  ;;  %vm655_vm5 = vcmp.lt.s32.totalorder %v2413_v34, 0 }
 0x199   :  { %v2270_v29 = vpop.eup %2269  ;;  %v638_v41 = vsel %vm3047_vm9, 0, %v636_v27  ;;  %vm654_vm2 = vcmp.le.f32.partialorder %v653_v1, 0.7853982  ;;  %v740_v4 = vsel %vm655_vm5, %v739_v35, %v2975_v42  ;;  %v1958_v1 = vld [vmem:[%s3869_s4 + $0x18] sm:$0xff]  ;;  %vm641_vm12 = vweird.f32 %v2409_v28 }
 0x19a   :  { %v2272_v17 = vpop.eup %2271  ;;  %v732_v39 = vor.u32 4788187, %v731_v31  ;;  %v961_v45 = vxor.u32 2147483648, %v2270_v29  ;;  %v735_v60 = vcvt.s32.f32 %v728_v63  ;;  %1007 = vperm.xlu0 %2239, %v981_v15   ;;  %1012 = vperm.xlu1 %2240, %v982_v24   ;;  %v642_v33 = vadd.s32 3, %v638_v41  ;;  %v2248_v28 = vld [vmem:[%s3867_s2 + $0x18] sm:$0xff]  }
 0x19b   :  { %v958_v32 = vxor.u32 2147483648, %v2272_v17  ;;  %v742_v53 = vsel %vm654_vm2, 0, %v740_v4  ;;  %vm745_vm13 = vweird.f32 %v2413_v34 }
 0x19c   :  { %v733_v7 = vand.u32 2147483647, %v732_v39  ;;  %v962_v54 = vsel %vm960_vm14, %v961_v45, %v2272_v17  ;;  %v746_v51 = vadd.s32 3, %v742_v53  ;;  %v643_v42 = vand.u32 3, %v642_v33 }
 0x19d   :  { %v959_v47 = vsel %vm957_vm15, %v2270_v29, %v958_v32  ;;  %v2247_v29 = vld [vmem:[%s3867_s2 + $0x8] sm:$0xff]   ;;  %s2344_s2 = smov [#allocation2]  }
 0x19e   :  { %v736_v20 = vmul.f32 %v735_v60, %v733_v7  ;;  %v963_v6 = vsel %vm956_vm1, %v959_v47, %v962_v54  ;;  %1017 = vperm.xlu0 %2239, %v983_v22   ;;  %1022 = vperm.xlu1 %2240, %v984_v25   ;;  %v747_v49 = vand.u32 3, %v746_v51  ;;  %vm645_vm3 = vcmp.eq.s32.totalorder %v643_v42, 0  ;;  %s2031_s12 = sshll.u32 %s2344_s2, 4  ;;  %s2032_s12 = int_to_ptr.vmem [resolvable:$true] %s2031_s12 }
 0x19f   :  { %v964_v5 = vsel %vm953_vm4, nan, %v963_v6  ;;  %v2274_v56 = vpop.eup %2273  ;;  %vm648_vm6 = vcmp.eq.s32.totalorder %v643_v42, 2  ;;  %vm644_vm7 = vcmp.lt.s32.totalorder %v643_v42, 2  ;;  %s2313_s13 = scalar_lea.vmem %s2032_s12, 16  ;;  %s2317_s14 = scalar_lea.vmem %s2032_s12, 32 }
 0x1a0   :  { %v737_v23 = vxor.u32 2147483648, %v736_v20  ;;  %v3076_v8 = vpack.c.bf16 %v964_v5, %v860_v12  ;;  %v2276_v57 = vpop.eup %2275  ;;  %v649_v2 = vxor.u32 2147483648, %v2274_v56  ;;  %vm752_vm8 = vcmp.eq.s32.totalorder %v747_v49, 2  ;;  %p2314_p0 = scmp.ne.s32.totalorder %s2032_s12, %s2313_s13  ;;  %p2318_p1 = scmp.lt.s32.totalorder %s2032_s12, %s2032_s12 }
 0x1a1   :  { %v646_v37 = vxor.u32 2147483648, %v2276_v57  ;;  %vm749_vm9 = vcmp.eq.s32.totalorder %v747_v49, 0  ;;  %vm748_vm11 = vcmp.lt.s32.totalorder %v747_v49, 2  ;;  %p2319_p2 = scmp.lt.s32.totalorder %s2317_s14, %s2313_s13 }
 0x1a2   :  { %v738_v36 = vsel %vm655_vm5, %v737_v23, %v736_v20  ;;  %1965 = vperm.xlu0 %2239, %v1955_v30   ;;  %1970 = vperm.xlu1 %2240, %v1956_v26   ;;  %v650_v52 = vsel %vm648_vm6, %v649_v2, %v2276_v57 }
 0x1a3   :  { %v741_v13 = vsel %vm654_vm2, %v2413_v34, %v738_v36  ;;  %v647_v59 = vsel %vm645_vm3, %v2274_v56, %v646_v37  ;;  %p2320_p3 = por %p2319_p2, %p2318_p1 }
 0x1a4   :  { %2277 = vcosq.f32 %v741_v13  ;;  %v651_v14 = vsel %vm644_vm7, %v647_v59, %v650_v52 }
 0x1a5   :  { %2279 = vsinq.f32 %v741_v13  ;;  %v652_v31 = vsel %vm641_vm12, nan, %v651_v14  ;;  %p2321_p4 = pnand %p2320_p3, %p2314_p0 }
 0x1a6   :  { %1975 = vperm.xlu0 %2239, %v1957_v0   ;;  %1980 = vperm.xlu1 %2240, %v1958_v1  }
 0x1aa   :  { %1985 = vperm.xlu0 %2239, %v1959_v43   ;;  %1990 = vperm.xlu1 %2240, %v1960_v61  }
 0x1ae   :  { %v2278_v16 = vpop.eup %2277  ;;  %1995 = vperm.xlu0 %2239, %v1961_v62   ;;  %2000 = vperm.xlu1 %2240, %v1962_v38   ;;  %v3898_v38 = vmov 1326507024  }
 0x1af   :  { %v2280_v9 = vpop.eup %2279  ;;  %v753_v55 = vxor.u32 2147483648, %v2278_v16 }
 0x1b0   :  { %v750_v19 = vxor.u32 2147483648, %v2280_v9 }
 0x1b1   :  { %v754_v58 = vsel %vm752_vm8, %v753_v55, %v2280_v9 }
 0x1b2   :  { %v751_v3 = vsel %vm749_vm9, %v2278_v16, %v750_v19 }
 0x1b3   :  { %v755_v63 = vsel %vm748_vm11, %v751_v3, %v754_v58 }
 0x1b4   :  { %v756_v11 = vsel %vm745_vm13, nan, %v755_v63 }
 0x1b5   :  { %v975_v21 = vpack.c.bf16 %v756_v11, %v652_v31 }
 0x1b7   :  { %2146 = vmatprep.subr.bf16.mxu0 %v975_v21  ;;  %2160 = vmatprep.subr.bf16.mxu1 %v975_v21 }
 0x1b8   :  { %2147 = vmatpush3.bf16.msra.mxu0 %v975_v21  ;;  %2164 = vmatpush3.bf16.msra.mxu1 %v975_v21 }
 0x1b9   :  { %2148 = vmatprep.subr.bf16.mxu0 %v3076_v8  ;;  %2161 = vmatprep.subr.bf16.mxu1 %v3076_v8 }
 0x1bc   :  { %2149 = vmatpush3.bf16.msra.mxu0 %v3076_v8  ;;  %2165 = vmatpush3.bf16.msra.mxu1 %v3076_v8 }
 0x1bf   :  { %2151 = vmatmul.mubr.msk.bf16.vlgmr.msra.gmra.mrb[8].mxu0 %vm1045_vm10, %v2247_v29  ;;  %2155 = vmatmul.mubr.msk.bf16.vlgmr.msra.gmra.mrb[0].mxu1 %vm1045_vm10, %v2248_v28 }
 0x211   :  { %v988_v34 = vpop.permute.xlu0 %987  ;;  %v998_v17 = vpop.permute.xlu1 %997 }
 0x215   :  { %v3123_v15 = vpop.permute.xlu0 %992 }
 0x219   :  { %v3125_v24 = vpop.permute.xlu0 %1007 }
 0x21d   :  { %v1018_v18 = vpop.permute.xlu0 %1017 }
 0x292   :  { %v2152_v39 = vpop.f32.mrb[8].mxu0  ;;  %v2156_v45 = vpop.f32.mrb[0].mxu1 }
 0x293   :  { %v3127_v10 = vadd.f32 %v2152_v39, %v998_v17  ;;  %v3129_v32 = vadd.f32 %v2156_v45, %v1018_v18  ;;  %v1092_v7 = vpop.f32.mrb[9].mxu0  ;;  %v3131_v60 = vpop.f32.mrb[1].mxu1 }
 0x294   :  { %v3133_v54 = vpop.f32.mrb[10].mxu0  ;;  %v3135_v47 = vpop.f32.mrb[2].mxu1  ;;  %v3146_v8 = vadd.f32 %v1092_v7, %v988_v34 }
 0x295   :  { %v1331_v22 = vand.u32 2147483647, %v3127_v10  ;;  %v1334_v25 = vand.u32 2139095040, %v3127_v10  ;;  %v3139_v20 = vpop.f32.mrb[11].mxu0  ;;  %v3141_v35 = vpop.f32.mrb[3].mxu1  ;;  %v1750_v6 = vand.u32 2139095040, %v3129_v32 }
 0x296   :  { %v1126_v36 = vand.u32 2139095040, %v3146_v8 }
 0x297   :  { %v1335_v27 = vshrl.u32 %v1334_v25, 23  ;;  %v1751_v12 = vshrl.u32 %v1750_v6, 23  ;;  %v1338_v23 = vand.u32 8388607, %v1331_v22 }
 0x298   :  { %v1127_v0 = vshrl.u32 %v1126_v36, 23 }
 0x299   :  { %v2095_v5 = vadd.s32 4294967169, %v1335_v27  ;;  %v2111_v30 = vadd.s32 4294967169, %v1751_v12  ;;  %v1339_v41 = vor.u32 8388608, %v1338_v23 }
 0x29a   :  { %v2087_v31 = vadd.s32 4294967169, %v1127_v0 }
 0x29b   :  { %v1341_v26 = vadd.s32 1, %v2095_v5  ;;  %v1757_v13 = vadd.s32 1, %v2111_v30  ;;  %v1379_v53 = vshll.u32 %v1339_v41, 8 }
 0x29c   :  { %v1133_v5 = vadd.s32 1, %v2087_v31 }
 0x29d   :  { %vm1342_vm10 = vcmp.gt.s32.totalorder %v1341_v26, 0  ;;  %vm1758_vm14 = vcmp.gt.s32.totalorder %v1757_v13, 0 }
 0x29e   :  { %v1343_v4 = vsel %vm1342_vm10, %v1341_v26, 0  ;;  %v1759_v55 = vsel %vm1758_vm14, %v1757_v13, 0  ;;  %v3874_v26 = vand.u32 2147483647, %v3129_v32  ;;  %vm1134_vm2 = vcmp.gt.s32.totalorder %v1133_v5, 0 }
 0x29f   :  { %v1345_v56 = vand.u32 31, %v1343_v4  ;;  %v1344_v1 = vshrl.u32 %v1343_v4, 5  ;;  %v1761_v17 = vand.u32 31, %v1759_v55  ;;  %v3878_v4 = vand.u32 2147483647, %v3146_v8 }
 0x2a0   :  { %v1754_v0 = vand.u32 8388607, %v3874_v26 }
 0x2a1   :  { %v1346_v33 = vsub.s32 32, %v1345_v56  ;;  %v1348_v57 = vshll.u32 %v3879_v40, %v1345_v56  ;;  %v1351_v51 = vshll.u32 %v2338_v44, %v1345_v56  ;;  %v1354_v61 = vshll.u32 %v2339_v46, %v1345_v56 }
 0x2a2   :  { %v1357_v2 = vshll.u32 %v2340_v48, %v1345_v56  ;;  %v1360_v62 = vshll.u32 %v3881_v50, %v1345_v56  ;;  %vm1363_vm15 = vcmp.lt.s32.totalorder %v1344_v1, 1  ;;  %vm1366_vm0 = vcmp.lt.s32.totalorder %v1344_v1, 4 }
 0x2a3   :  { %v1349_v42 = vshrl.u32 %v2338_v44, %v1346_v33  ;;  %v1352_v43 = vshrl.u32 %v2339_v46, %v1346_v33  ;;  %v1355_v37 = vshrl.u32 %v2340_v48, %v1346_v33  ;;  %v1358_v49 = vshrl.u32 %v3881_v50, %v1346_v33 }
 0x2a4   :  { %v1361_v16 = vshrl.u32 %v3898_v38, %v1346_v33  ;;  %v1347_v11 = vshrl.u32 %v3879_v40, %v1346_v33  ;;  %vm1365_vm1 = vcmp.lt.s32.totalorder %v1344_v1, 3  ;;  %vm1364_vm4 = vcmp.lt.s32.totalorder %v1344_v1, 2 }
 0x2a5   :  { %v1350_v59 = vor.u32 %v1349_v42, %v1348_v57  ;;  %v1353_v52 = vor.u32 %v1352_v43, %v1351_v51  ;;  %v1356_v9 = vor.u32 %v1355_v37, %v1354_v61  ;;  %v1359_v19 = vor.u32 %v1358_v49, %v1357_v2 }
 0x2a6   :  { %v1362_v14 = vor.u32 %v1361_v16, %v1360_v62  ;;  %v3171_v41 = vsub.s32 32, %v1761_v17  ;;  %v3177_v33 = vadd.f32 %v3131_v60, %v3125_v24  ;;  %v3191_v24 = vand.u32 8388607, %v3878_v4 }
 0x2a7   :  { %v1368_v58 = vsel %vm1366_vm0, %v1356_v9, 2102212464  ;;  %v1371_v3 = vsel %vm1363_vm15, %v1350_v59, %v1353_v52  ;;  %v1375_v63 = vsel %vm1363_vm15, %v1353_v52, %v1356_v9  ;;  %v1372_v21 = vsel %vm1366_vm0, %v1359_v19, 920167782 }
 0x2a8   :  { %v1376_v29 = vsel %vm1366_vm0, %v1362_v14, 1326507024  ;;  %v1373_v28 = vsel %vm1365_vm1, %v1356_v9, %v1372_v21  ;;  %v1367_v18 = vsel %vm1363_vm15, %v1347_v11, %v1350_v59  ;;  %v1369_v39 = vsel %vm1365_vm1, %v1353_v52, %v1368_v58 }
 0x2a9   :  { %v1377_v34 = vsel %vm1365_vm1, %v1359_v19, %v1376_v29  ;;  %v1374_v45 = vsel %vm1364_vm4, %v1371_v3, %v1373_v28  ;;  %v1370_v23 = vsel %vm1364_vm4, %v1367_v18, %v1369_v39  ;;  %v1765_v1 = vshrl.u32 %v2338_v44, %v3171_v41 }
 0x2aa   :  { %v1378_v7 = vsel %vm1364_vm4, %v1375_v63, %v1377_v34  ;;  %v3163_v27 = vmul.u32.u64.low %v1379_v53, %v1374_v45  ;;  %v3164_v12 = vmul.u32.u64.high %v1379_v53, %v1374_v45, %v3163_v27  ;;  %v1386_v36 = vmul.u32 %v1379_v53, %v1370_v23 }
 0x2ab   :  { %v3160_v25 = vmul.u32.u64.low %v1379_v53, %v1378_v7  ;;  %v3161_v6 = vmul.u32.u64.high %v1379_v53, %v1378_v7, %v3160_v25  ;;  %v1768_v57 = vshrl.u32 %v2339_v46, %v3171_v41  ;;  %v1135_v53 = vsel %vm1134_vm2, %v1133_v5, 0 }
 0x2ac   :  { %v1389_v30 = vadd.s32 1, %v3164_v12  ;;  %v1771_v42 = vshrl.u32 %v2340_v48, %v3171_v41  ;;  %v1774_v43 = vshrl.u32 %v3881_v50, %v3171_v41  ;;  %v3193_v60 = vshrl.u32 %v1759_v55, 5 }
 0x2ad   :  { %vm1388_vm5 = vc.u32 %v3161_v6, %v3163_v27  ;;  %v1764_v61 = vshll.u32 %v3879_v40, %v1761_v17  ;;  %v1767_v37 = vshll.u32 %v2338_v44, %v1761_v17  ;;  %v1777_v2 = vshrl.u32 %v3898_v38, %v3171_v41 }
 0x2ae   :  { %v1390_v13 = vsel %vm1388_vm5, %v1389_v30, %v3164_v12  ;;  %v1770_v62 = vshll.u32 %v2339_v46, %v1761_v17  ;;  %v1773_v16 = vshll.u32 %v2340_v48, %v1761_v17  ;;  %v1137_v59 = vand.u32 31, %v1135_v53 }
 0x2af   :  { %v1391_v56 = vadd.s32 %v1390_v13, %v1386_v36  ;;  %v3203_v52 = vor.u32 %v1765_v1, %v1764_v61  ;;  %v3205_v9 = vor.u32 %v1768_v57, %v1767_v37  ;;  %v1776_v55 = vshll.u32 %v3881_v50, %v1761_v17 }
 0x2b0   :  { %v1542_v19 = vand.u32 2139095040, %v3177_v33  ;;  %v3210_v58 = vor.u32 %v1771_v42, %v1770_v62  ;;  %v1775_v3 = vor.u32 %v1774_v43, %v1773_v16  ;;  %v3212_v63 = vsub.s32 32, %v1137_v59 }
 0x2b1   :  { %v1392_v51 = vadd.s32 536870912, %v1391_v56  ;;  %v1778_v31 = vor.u32 %v1777_v2, %v1776_v55  ;;  %v1755_v21 = vor.u32 8388608, %v1754_v0  ;;  %vm1779_vm3 = vcmp.lt.s32.totalorder %v3193_v60, 1 }
 0x2b2   :  { %v1131_v29 = vor.u32 8388608, %v3191_v24  ;;  %vm1781_vm6 = vcmp.lt.s32.totalorder %v3193_v60, 3  ;;  %vm1782_vm7 = vcmp.lt.s32.totalorder %v3193_v60, 4  ;;  %v1787_v28 = vsel %vm1779_vm3, %v3203_v52, %v3205_v9 }
 0x2b3   :  { %v3199_v49 = vshrl.u32 %v1392_v51, 30  ;;  %v1543_v34 = vshrl.u32 %v1542_v19, 23  ;;  %v1788_v18 = vsel %vm1782_vm7, %v1775_v3, 920167782  ;;  %v1791_v39 = vsel %vm1779_vm3, %v3205_v9, %v3210_v58 }
 0x2b4   :  { %v1141_v45 = vshrl.u32 %v2338_v44, %v3212_v63  ;;  %v1792_v7 = vsel %vm1782_vm7, %v1778_v31, 1326507024  ;;  %v3235_v25 = vshrl.u32 %v1135_v53, 5  ;;  %v1144_v12 = vshrl.u32 %v2339_v46, %v3212_v63 }
 0x2b5   :  { %v1394_v14 = vshll.u32 %v3199_v49, 30  ;;  %v1147_v5 = vshrl.u32 %v2340_v48, %v3212_v63  ;;  %v1140_v30 = vshll.u32 %v3879_v40, %v1137_v59  ;;  %v1143_v36 = vshll.u32 %v2338_v44, %v1137_v59 }
 0x2b6   :  { %v1150_v13 = vshrl.u32 %v3881_v50, %v3212_v63  ;;  %v1149_v0 = vshll.u32 %v2340_v48, %v1137_v59  ;;  %v1152_v1 = vshll.u32 %v3881_v50, %v1137_v59  ;;  %v1153_v57 = vshrl.u32 %v3898_v38, %v3212_v63 }
 0x2b7   :  { %v3214_v11 = vsub.s32 %v1391_v56, %v1394_v14  ;;  %v1146_v56 = vshll.u32 %v2339_v46, %v1137_v59  ;;  %v1789_v51 = vsel %vm1781_vm6, %v3210_v58, %v1788_v18  ;;  %v1793_v42 = vsel %vm1781_vm6, %v1775_v3, %v1792_v7 }
 0x2b8   :  { %v3256_v43 = vor.u32 %v1141_v45, %v1140_v30  ;;  %v3258_v24 = vor.u32 %v1144_v12, %v1143_v36  ;;  %v1151_v37 = vor.u32 %v1150_v13, %v1149_v0  ;;  %v1154_v2 = vor.u32 %v1153_v57, %v1152_v1 }
 0x2b9   :  { %v1397_v17 = vsub.s32 0, %v3214_v11  ;;  %v1148_v61 = vor.u32 %v1147_v5, %v1146_v56  ;;  %vm1780_vm8 = vcmp.lt.s32.totalorder %v3193_v60, 2  ;;  %v3261_v16 = vshll.u32 %v1755_v21, 8 }
 0x2ba   :  { %vm1158_vm9 = vcmp.lt.s32.totalorder %v3235_v25, 4  ;;  %v1387_v59 = vadd.s32 %v3163_v27, %v3161_v6  ;;  %v1790_v55 = vsel %vm1780_vm8, %v1787_v28, %v1789_v51  ;;  %v1794_v19 = vsel %vm1780_vm8, %v1791_v39, %v1793_v42 }
 0x2bb   :  { %v2096_v23 = vmin.u32 %v1397_v17, %v3214_v11  ;;  %v1164_v14 = vsel %vm1158_vm9, %v1151_v37, 920167782  ;;  %vm1155_vm12 = vcmp.lt.s32.totalorder %v3235_v25, 1  ;;  %vm1157_vm13 = vcmp.lt.s32.totalorder %v3235_v25, 3 }
 0x2bc   :  { %v1168_v3 = vsel %vm1158_vm9, %v1154_v2, 1326507024  ;;  %v1163_v6 = vsel %vm1155_vm12, %v3256_v43, %v3258_v24  ;;  %v1165_v27 = vsel %vm1157_vm13, %v1148_v61, %v1164_v14  ;;  %v2103_v21 = vadd.s32 4294967169, %v1543_v34 }
 0x2bd   :  { %v1399_v53 = vclz %v2096_v23  ;;  %v1167_v18 = vsel %vm1155_vm12, %v3258_v24, %v1148_v61  ;;  %v1169_v39 = vsel %vm1157_vm13, %v1151_v37, %v1168_v3  ;;  %vm1156_vm10 = vcmp.lt.s32.totalorder %v3235_v25, 2 }
 0x2be   :  { %v3288_v45 = vmul.u32.u64.low %v3261_v16, %v1790_v55  ;;  %v3289_v7 = vmul.u32.u64.high %v3261_v16, %v1790_v55, %v3288_v45  ;;  %v3293_v12 = vshll.u32 %v1131_v29, 8  ;;  %v1166_v30 = vsel %vm1156_vm10, %v1163_v6, %v1165_v27 }
 0x2bf   :  { %v2097_v62 = vadd.s32 4294967294, %v1399_v53  ;;  %v3299_v36 = vmul.u32.u64.low %v3261_v16, %v1794_v19  ;;  %v3300_v13 = vmul.u32.u64.high %v3261_v16, %v1794_v19, %v3299_v36  ;;  %v1170_v56 = vsel %vm1156_vm10, %v1167_v18, %v1169_v39 }
 0x2c0   :  { %v1549_v0 = vadd.s32 1, %v2103_v21  ;;  %v1763_v29 = vshrl.u32 %v3879_v40, %v3171_v41  ;;  %v3310_v53 = vmul.u32.u64.low %v3293_v12, %v1166_v30  ;;  %v3311_v51 = vmul.u32.u64.high %v3293_v12, %v1166_v30, %v3310_v53 }
 0x2c1   :  { %vm2098_vm11 = vcmp.lt.s32.totalorder %v2097_v62, 0  ;;  %v3315_v37 = vmul.u32.u64.low %v3293_v12, %v1170_v56  ;;  %v3316_v2 = vmul.u32.u64.high %v3293_v12, %v1170_v56, %v3315_v37  ;;  %v1160_v3 = vsel %vm1158_vm9, %v1148_v61, 2102212464 }
 0x2c2   :  { %v1402_v31 = vsel %vm2098_vm11, 0, %v2097_v62  ;;  %vm1550_vm14 = vcmp.gt.s32.totalorder %v1549_v0, 0  ;;  %v1783_v41 = vsel %vm1779_vm3, %v1763_v29, %v3203_v52  ;;  %vm1333_vm15 = vcmp.lt.s32.totalorder %v3127_v10, 0 }
 0x2c3   :  { %v1403_v28 = vsub.s32 32, %v1402_v31  ;;  %v1407_v17 = vsub.s32 4294967266, %v1402_v31  ;;  %v1404_v34 = vshll.u32 %v3214_v11, %v1402_v31  ;;  %v1784_v11 = vsel %vm1782_vm7, %v3210_v58, 2102212464 }
 0x2c4   :  { %v1551_v62 = vsel %vm1550_vm14, %v1549_v0, 0  ;;  %v1785_v19 = vsel %vm1781_vm6, %v3205_v9, %v1784_v11  ;;  %v1805_v6 = vadd.s32 1, %v3289_v7  ;;  %v1139_v27 = vshrl.u32 %v3879_v40, %v3212_v63 }
 0x2c5   :  { %v1405_v5 = vshrl.u32 %v1387_v59, %v1403_v28  ;;  %v1408_v23 = vadd.s32 127, %v1407_v17  ;;  %v1417_v59 = vsub.s32 4, %v3199_v49  ;;  %v1553_v14 = vand.u32 31, %v1551_v62 }
 0x2c6   :  { %v1786_v21 = vsel %vm1780_vm8, %v1783_v41, %v1785_v19  ;;  %vm1804_vm0 = vc.u32 %v3300_v13, %v3288_v45  ;;  %v1159_v61 = vsel %vm1155_vm12, %v1139_v27, %v3256_v43  ;;  %v1161_v28 = vsel %vm1157_vm13, %v3258_v24, %v1160_v3 }
 0x2c7   :  { %v1406_v1 = vor.u32 %v1405_v5, %v1404_v34  ;;  %v1409_v57 = vshll.u32 %v1408_v23, 23  ;;  %v1418_v52 = vsel %vm1333_vm15, %v1417_v59, %v3199_v49  ;;  %v3342_v17 = vsub.s32 32, %v1553_v14 }
 0x2c8   :  { %v1181_v63 = vadd.s32 1, %v3311_v51  ;;  %vm1332_vm1 = vcmp.le.f32.partialorder %v1331_v22, 0.7853982  ;;  %v1806_v49 = vsel %vm1804_vm0, %v1805_v6, %v3289_v7  ;;  %vm1180_vm4 = vc.u32 %v3316_v2, %v3310_v53 }
 0x2c9   :  { %v1410_v42 = vor.u32 4788187, %v1409_v57  ;;  %v1413_v58 = vcvt.s32.f32 %v1406_v1  ;;  %v1420_v43 = vsel %vm1332_vm1, 0, %v1418_v52  ;;  %v1802_v39 = vmul.u32 %v3261_v16, %v1786_v21  ;;  %v1003_v21 = vpop.permute.xlu1 %1002 }
 0x2ca   :  { %v1162_v24 = vsel %vm1156_vm10, %v1159_v61, %v1161_v28  ;;  %v3875_v34 = vand.u32 2147483647, %v3177_v33  ;;  %v1566_v22 = vshrl.u32 %v3881_v50, %v3342_v17  ;;  %v1182_v7 = vsel %vm1180_vm4, %v1181_v63, %v3311_v51 }
 0x2cb   :  { %v1411_v55 = vand.u32 2147483647, %v1410_v42  ;;  %v1807_v5 = vadd.s32 %v1806_v49, %v1802_v39  ;;  %v1424_v23 = vadd.s32 3, %v1420_v43  ;;  %v1178_v30 = vmul.u32 %v3293_v12, %v1162_v24 }
 0x2cc   :  { %v1565_v36 = vshll.u32 %v2340_v48, %v1553_v14  ;;  %v1569_v16 = vshrl.u32 %v3898_v38, %v3342_v17  ;;  %v3362_v25 = vshrl.u32 %v1551_v62, 5  ;;  %v1557_v56 = vshrl.u32 %v2338_v44, %v3342_v17 }
 0x2cd   :  { %v1414_v31 = vmul.f32 %v1413_v58, %v1411_v55  ;;  %v1560_v0 = vshrl.u32 %v2339_v46, %v3342_v17  ;;  %v1563_v1 = vshrl.u32 %v2340_v48, %v3342_v17  ;;  %v1183_v57 = vadd.s32 %v1182_v7, %v1178_v30 }
 0x2ce   :  { %v1546_v12 = vand.u32 8388607, %v3875_v34  ;;  %v1567_v29 = vor.u32 %v1566_v22, %v1565_v36  ;;  %v1568_v11 = vshll.u32 %v3881_v50, %v1553_v14  ;;  %v1808_v51 = vadd.s32 536870912, %v1807_v5 }
 0x2cf   :  { %v1415_v9 = vxor.u32 2147483648, %v1414_v31  ;;  %v1556_v42 = vshll.u32 %v3879_v40, %v1553_v14  ;;  %v1559_v37 = vshll.u32 %v2338_v44, %v1553_v14  ;;  %v1562_v62 = vshll.u32 %v2339_v46, %v1553_v14 }
 0x2d0   :  { %v1425_v59 = vand.u32 3, %v1424_v23  ;;  %v1570_v41 = vor.u32 %v1569_v16, %v1568_v11  ;;  %vm1574_vm5 = vcmp.lt.s32.totalorder %v3362_v25, 4  ;;  %v1184_v3 = vadd.s32 536870912, %v1183_v57 }
 0x2d1   :  { %v1416_v60 = vsel %vm1333_vm15, %v1415_v9, %v1414_v31  ;;  %v1558_v55 = vor.u32 %v1557_v56, %v1556_v42  ;;  %v1561_v58 = vor.u32 %v1560_v0, %v1559_v37  ;;  %v1564_v19 = vor.u32 %v1563_v1, %v1562_v62 }
 0x2d2   :  { %v1419_v18 = vsel %vm1332_vm1, %v3127_v10, %v1416_v60  ;;  %v1580_v31 = vsel %vm1574_vm5, %v1567_v29, 920167782  ;;  %v3379_v6 = vshrl.u32 %v1808_v51, 30  ;;  %v1547_v27 = vor.u32 8388608, %v1546_v12 }
 0x2d3   :  { %2281 = vcosq.f32 %v1419_v18  ;;  %vm1430_vm2 = vcmp.eq.s32.totalorder %v1425_v59, 2  ;;  %vm1571_vm3 = vcmp.lt.s32.totalorder %v3362_v25, 1  ;;  %vm1573_vm6 = vcmp.lt.s32.totalorder %v3362_v25, 3 }
 0x2d4   :  { %2283 = vsinq.f32 %v1419_v18  ;;  %v1584_v14 = vsel %vm1574_vm5, %v1570_v41, 1326507024  ;;  %v1579_v28 = vsel %vm1571_vm3, %v1558_v55, %v1561_v58  ;;  %v1581_v63 = vsel %vm1573_vm6, %v1564_v19, %v1580_v31 }
 0x2d5   :  { %v3390_v60 = vadd.f32 %v3133_v54, %v1003_v21  ;;  %v3392_v18 = vshrl.u32 %v1184_v3, 30  ;;  %v1583_v43 = vsel %vm1571_vm3, %v1561_v58, %v1564_v19  ;;  %v1585_v39 = vsel %vm1573_vm6, %v1567_v29, %v1584_v14 }
 0x2d6   :  { %vm1423_vm7 = vweird.f32 %v3127_v10  ;;  %vm1427_vm8 = vcmp.eq.s32.totalorder %v1425_v59, 0  ;;  %vm1572_vm9 = vcmp.lt.s32.totalorder %v3362_v25, 2  ;;  %vm1426_vm11 = vcmp.lt.s32.totalorder %v1425_v59, 2 }
 0x2d7   :  { %v1582_v54 = vsel %vm1572_vm9, %v1579_v28, %v1581_v63  ;;  %v1587_v7 = vshll.u32 %v1547_v27, 8  ;;  %v1810_v30 = vshll.u32 %v3379_v6, 30  ;;  %v1586_v36 = vsel %vm1572_vm9, %v1583_v43, %v1585_v39 }
 0x2d8   :  { %v1438_v16 = vand.u32 2139095040, %v3390_v60  ;;  %v1186_v10 = vshll.u32 %v3392_v18, 30  ;;  %v1576_v59 = vsel %vm1574_vm5, %v1564_v19, 2102212464  ;;  %v1555_v3 = vshrl.u32 %v3879_v40, %v3342_v17 }
 0x2d9   :  { %v3409_v0 = vmul.u32.u64.low %v1587_v7, %v1582_v54  ;;  %v3410_v1 = vmul.u32.u64.high %v1587_v7, %v1582_v54, %v3409_v0  ;;  %v3413_v29 = vmul.u32.u64.low %v1587_v7, %v1586_v36  ;;  %v3414_v11 = vmul.u32.u64.high %v1587_v7, %v1586_v36, %v3413_v29 }
 0x2da   :  { %v1439_v12 = vshrl.u32 %v1438_v16, 23  ;;  %v3416_v51 = vsub.s32 %v1807_v5, %v1810_v30  ;;  %v3418_v37 = vsub.s32 %v1183_v57, %v1186_v10  ;;  %v3876_v27 = vand.u32 2147483647, %v3390_v60 }
 0x2db   :  { %v3429_v5 = vadd.f32 %v3139_v20, %v3123_v15  ;;  %v1575_v57 = vsel %vm1571_vm3, %v1555_v3, %v1558_v55  ;;  %v1577_v19 = vsel %vm1573_vm6, %v1561_v58, %v1576_v59  ;;  %v1597_v21 = vadd.s32 1, %v3410_v1 }
 0x2dc   :  { %v2099_v42 = vadd.s32 4294967169, %v1439_v12  ;;  %v1813_v41 = vsub.s32 0, %v3416_v51  ;;  %v1189_v31 = vsub.s32 0, %v3418_v37  ;;  %vm1596_vm13 = vc.u32 %v3414_v11, %v3409_v0 }
 0x2dd   :  { %v2282_v52 = vpop.eup %2281  ;;  %v1578_v15 = vsel %vm1572_vm9, %v1575_v57, %v1577_v19  ;;  %v1442_v20 = vand.u32 8388607, %v3876_v27  ;;  %v1598_v55 = vsel %vm1596_vm13, %v1597_v21, %v3410_v1  ;;  %v1230_v63 = vand.u32 2139095040, %v3429_v5 }
 0x2de   :  { %v2284_v9 = vpop.eup %2283  ;;  %v1431_v61 = vxor.u32 2147483648, %v2282_v52  ;;  %v1445_v62 = vadd.s32 1, %v2099_v42  ;;  %v1594_v36 = vmul.u32 %v1587_v7, %v1578_v15 }
 0x2df   :  { %v1428_v49 = vxor.u32 2147483648, %v2284_v9  ;;  %v1443_v16 = vor.u32 8388608, %v1442_v20 }
 0x2e0   :  { %v1432_v24 = vsel %vm1430_vm2, %v1431_v61, %v2284_v9  ;;  %vm1446_vm12 = vcmp.gt.s32.totalorder %v1445_v62, 0  ;;  %v2112_v9 = vmin.u32 %v1813_v41, %v3416_v51  ;;  %v2088_v61 = vmin.u32 %v1189_v31, %v3418_v37 }
 0x2e1   :  { %v1429_v22 = vsel %vm1427_vm8, %v2282_v52, %v1428_v49  ;;  %v1447_v52 = vsel %vm1446_vm12, %v1445_v62, 0  ;;  %v1599_v59 = vadd.s32 %v1598_v55, %v1594_v36  ;;  %v1231_v41 = vshrl.u32 %v1230_v63, 23 }
 0x2e2   :  { %v1433_v23 = vsel %vm1426_vm11, %v1429_v22, %v1432_v24  ;;  %v1449_v14 = vand.u32 31, %v1447_v52  ;;  %v1448_v49 = vshrl.u32 %v1447_v52, 5  ;;  %v1815_v30 = vclz %v2112_v9 }
 0x2e3   :  { %v3406_v56 = vsel %vm1423_vm7, nan, %v1433_v23  ;;  %v1191_v62 = vclz %v2088_v61  ;;  %v1483_v15 = vshll.u32 %v1443_v16, 8 }
 0x2e4   :  { %v1450_v17 = vsub.s32 32, %v1449_v14  ;;  %v1452_v58 = vshll.u32 %v3879_v40, %v1449_v14  ;;  %v1455_v43 = vshll.u32 %v2338_v44, %v1449_v14  ;;  %v1458_v24 = vshll.u32 %v2339_v46, %v1449_v14 }
 0x2e5   :  { %v1461_v54 = vshll.u32 %v2340_v48, %v1449_v14  ;;  %v1464_v29 = vshll.u32 %v3881_v50, %v1449_v14  ;;  %vm1467_vm10 = vcmp.lt.s32.totalorder %v1448_v49, 1  ;;  %vm1470_vm14 = vcmp.lt.s32.totalorder %v1448_v49, 4 }
 0x2e6   :  { %v1453_v28 = vshrl.u32 %v2338_v44, %v1450_v17  ;;  %v1456_v39 = vshrl.u32 %v2339_v46, %v1450_v17  ;;  %v1459_v22 = vshrl.u32 %v2340_v48, %v1450_v17  ;;  %v1462_v23 = vshrl.u32 %v3881_v50, %v1450_v17 }
 0x2e7   :  { %v1465_v42 = vshrl.u32 %v3898_v38, %v1450_v17  ;;  %v1451_v3 = vshrl.u32 %v3879_v40, %v1450_v17  ;;  %vm1469_vm15 = vcmp.lt.s32.totalorder %v1448_v49, 3  ;;  %vm1468_vm0 = vcmp.lt.s32.totalorder %v1448_v49, 2 }
 0x2e8   :  { %v1454_v25 = vor.u32 %v1453_v28, %v1452_v58  ;;  %v1457_v10 = vor.u32 %v1456_v39, %v1455_v43  ;;  %v1460_v1 = vor.u32 %v1459_v22, %v1458_v24  ;;  %v1463_v12 = vor.u32 %v1462_v23, %v1461_v54  ;;  %v1013_v22 = vpop.permute.xlu1 %1012 }
 0x2e9   :  { %v1466_v31 = vor.u32 %v1465_v42, %v1464_v29  ;;  %v1600_v14 = vadd.s32 536870912, %v1599_v59  ;;  %v2091_v43 = vadd.s32 4294967169, %v1231_v41  ;;  %v2089_v54 = vadd.s32 4294967294, %v1191_v62 }
 0x2ea   :  { %v1475_v52 = vsel %vm1467_vm10, %v1454_v25, %v1457_v10  ;;  %v1472_v57 = vsel %vm1470_vm14, %v1460_v1, 2102212464  ;;  %v1476_v7 = vsel %vm1470_vm14, %v1463_v12, 920167782  ;;  %v1479_v19 = vsel %vm1467_vm10, %v1457_v10, %v1460_v1 }
 0x2eb   :  { %v1477_v21 = vsel %vm1469_vm15, %v1460_v1, %v1476_v7  ;;  %v1480_v9 = vsel %vm1470_vm14, %v1466_v31, 1326507024  ;;  %v1471_v20 = vsel %vm1467_vm10, %v1451_v3, %v1454_v25  ;;  %v1473_v58 = vsel %vm1469_vm15, %v1457_v10, %v1472_v57 }
 0x2ec   :  { %v1478_v61 = vsel %vm1468_vm0, %v1475_v52, %v1477_v21  ;;  %v1481_v55 = vsel %vm1469_vm15, %v1463_v12, %v1480_v9  ;;  %v3466_v23 = vshrl.u32 %v1600_v14, 30  ;;  %v1474_v25 = vsel %vm1468_vm0, %v1471_v20, %v1473_v58  ;;  %v1023_v41 = vpop.permute.xlu1 %1022 }
 0x2ed   :  { %v1482_v28 = vsel %vm1468_vm0, %v1479_v19, %v1481_v55  ;;  %v3459_v17 = vmul.u32.u64.low %v1483_v15, %v1478_v61  ;;  %v3460_v63 = vmul.u32.u64.high %v1483_v15, %v1478_v61, %v3459_v17  ;;  %v2113_v36 = vadd.s32 4294967294, %v1815_v30 }
 0x2ee   :  { %v3463_v39 = vmul.u32.u64.low %v1483_v15, %v1482_v28  ;;  %v3464_v24 = vmul.u32.u64.high %v1483_v15, %v1482_v28, %v3463_v39  ;;  %v1237_v10 = vadd.s32 1, %v2091_v43  ;;  %v1490_v1 = vmul.u32 %v1483_v15, %v1474_v25 }
 0x2ef   :  { %v1493_v16 = vadd.s32 1, %v3460_v63  ;;  %v3877_v12 = vand.u32 2147483647, %v3429_v5  ;;  %vm2090_vm4 = vcmp.lt.s32.totalorder %v2089_v54, 0  ;;  %v1602_v29 = vshll.u32 %v3466_v23, 30 }
 0x2f0   :  { %vm1492_vm1 = vc.u32 %v3464_v24, %v3459_v17  ;;  %vm2114_vm5 = vcmp.lt.s32.totalorder %v2113_v36, 0  ;;  %vm1238_vm2 = vcmp.gt.s32.totalorder %v1237_v10, 0  ;;  %v3475_v49 = vsel %vm2090_vm4, 0, %v2089_v54 }
 0x2f1   :  { %v1494_v42 = vsel %vm1492_vm1, %v1493_v16, %v3460_v63  ;;  %v3478_v30 = vadd.f32 %v3135_v47, %v1023_v41  ;;  %v1234_v3 = vand.u32 8388607, %v3877_v12  ;;  %v1239_v31 = vsel %vm1238_vm2, %v1237_v10, 0 }
 0x2f2   :  { %v1495_v62 = vadd.s32 %v1494_v42, %v1490_v1  ;;  %v3482_v52 = vsel %vm2114_vm5, 0, %v2113_v36  ;;  %v3484_v57 = vsub.s32 %v1599_v59, %v1602_v29  ;;  %v1241_v19 = vand.u32 31, %v1239_v31 }
 0x2f3   :  { %v1199_v21 = vsub.s32 4294967266, %v3475_v49  ;;  %v1819_v15 = vsub.s32 32, %v3482_v52  ;;  %v1854_v14 = vand.u32 2139095040, %v3478_v30  ;;  %v1235_v20 = vor.u32 8388608, %v1234_v3 }
 0x2f4   :  { %v1496_v7 = vadd.s32 536870912, %v1495_v62  ;;  %v1242_v9 = vsub.s32 32, %v1241_v19  ;;  %v3490_v47 = vadd.f32 %v3141_v35, %v1013_v22  ;;  %v1605_v61 = vsub.s32 0, %v3484_v57 }
 0x2f5   :  { %v1244_v28 = vshll.u32 %v3879_v40, %v1241_v19  ;;  %v1247_v63 = vshll.u32 %v2338_v44, %v1241_v19  ;;  %v1250_v43 = vshll.u32 %v2339_v46, %v1241_v19  ;;  %v1823_v54 = vsub.s32 4294967266, %v3482_v52 }
 0x2f6   :  { %v3493_v55 = vshrl.u32 %v1496_v7, 30  ;;  %v1245_v59 = vshrl.u32 %v2338_v44, %v1242_v9  ;;  %v1248_v58 = vshrl.u32 %v2339_v46, %v1242_v9  ;;  %v1251_v39 = vshrl.u32 %v2340_v48, %v1242_v9 }
 0x2f7   :  { %v1195_v35 = vsub.s32 32, %v3475_v49  ;;  %v1200_v22 = vadd.s32 127, %v1199_v21  ;;  %v1240_v25 = vshrl.u32 %v1239_v31, 5  ;;  %v1646_v1 = vand.u32 2139095040, %v3490_v47 }
 0x2f8   :  { %v1246_v36 = vor.u32 %v1245_v59, %v1244_v28  ;;  %v1249_v16 = vor.u32 %v1248_v58, %v1247_v63  ;;  %v1252_v10 = vor.u32 %v1251_v39, %v1250_v43  ;;  %v1253_v29 = vshll.u32 %v2340_v48, %v1241_v19 }
 0x2f9   :  { %v1254_v42 = vshrl.u32 %v3881_v50, %v1242_v9  ;;  %v1256_v41 = vshll.u32 %v3881_v50, %v1241_v19  ;;  %v1257_v3 = vshrl.u32 %v3898_v38, %v1242_v9  ;;  %v2104_v7 = vmin.u32 %v1605_v61, %v3484_v57 }
 0x2fa   :  { %v1498_v26 = vshll.u32 %v3493_v55, 30  ;;  %v1855_v34 = vshrl.u32 %v1854_v14, 23  ;;  %v1275_v21 = vshll.u32 %v1235_v20, 8  ;;  %vm1259_vm3 = vcmp.lt.s32.totalorder %v1240_v25, 1 }
 0x2fb   :  { %v1255_v31 = vor.u32 %v1254_v42, %v1253_v29  ;;  %v1258_v59 = vor.u32 %v1257_v3, %v1256_v41  ;;  %vm1262_vm6 = vcmp.lt.s32.totalorder %v1240_v25, 4  ;;  %v1243_v58 = vshrl.u32 %v3879_v40, %v1242_v9 }
 0x2fc   :  { %v1264_v28 = vsel %vm1262_vm6, %v1252_v10, 2102212464  ;;  %v1267_v63 = vsel %vm1259_vm3, %v1246_v36, %v1249_v16  ;;  %v1271_v43 = vsel %vm1259_vm3, %v1249_v16, %v1252_v10  ;;  %vm1261_vm7 = vcmp.lt.s32.totalorder %v1240_v25, 3 }
 0x2fd   :  { %v1268_v19 = vsel %vm1262_vm6, %v1255_v31, 920167782  ;;  %v1272_v39 = vsel %vm1262_vm6, %v1258_v59, 1326507024  ;;  %v1647_v27 = vshrl.u32 %v1646_v1, 23  ;;  %v3513_v61 = vsub.s32 %v1495_v62, %v1498_v26 }
 0x2fe   :  { %vm1260_vm8 = vcmp.lt.s32.totalorder %v1240_v25, 2  ;;  %v1269_v14 = vsel %vm1261_vm7, %v1252_v10, %v1268_v19  ;;  %v1273_v20 = vsel %vm1261_vm7, %v1255_v31, %v1272_v39  ;;  %v1201_v29 = vshll.u32 %v1200_v22, 23 }
 0x2ff   :  { %v1270_v42 = vsel %vm1260_vm8, %v1267_v63, %v1269_v14  ;;  %v1274_v41 = vsel %vm1260_vm8, %v1271_v43, %v1273_v20  ;;  %v2107_v9 = vadd.s32 4294967169, %v1647_v27  ;;  %v1263_v3 = vsel %vm1259_vm3, %v1243_v58, %v1246_v36 }
 0x300   :  { %v1265_v12 = vsel %vm1261_vm7, %v1249_v16, %v1264_v28  ;;  %v3518_v4 = vmul.u32.u64.low %v1275_v21, %v1274_v41  ;;  %v3519_v40 = vmul.u32.u64.high %v1275_v21, %v1274_v41, %v3518_v4  ;;  %v2115_v50 = vadd.s32 4294967169, %v1855_v34 }
 0x301   :  { %v3521_v59 = vmul.u32.u64.low %v1275_v21, %v1270_v42  ;;  %v3522_v1 = vmul.u32.u64.high %v1275_v21, %v1270_v42, %v3521_v59  ;;  %v1653_v26 = vadd.s32 1, %v2107_v9  ;;  %v1803_v62 = vadd.s32 %v3288_v45, %v3300_v13 }
 0x302   :  { %v1179_v22 = vadd.s32 %v3310_v53, %v3316_v2  ;;  %v1607_v10 = vclz %v2104_v7  ;;  %v1501_v27 = vsub.s32 0, %v3513_v61  ;;  %v1820_v36 = vshll.u32 %v3416_v51, %v3482_v52 }
 0x303   :  { %v1266_v4 = vsel %vm1260_vm8, %v1263_v3, %v1265_v12  ;;  %vm1654_vm9 = vcmp.gt.s32.totalorder %v1653_v26, 0  ;;  %v1821_v34 = vshrl.u32 %v1803_v62, %v1819_v15  ;;  %v1824_v16 = vadd.s32 127, %v1823_v54 }
 0x304   :  { %v1197_v31 = vshrl.u32 %v1179_v22, %v1195_v35  ;;  %vm1284_vm11 = vc.u32 %v3519_v40, %v3521_v59  ;;  %v1202_v45 = vor.u32 4788187, %v1201_v29  ;;  %v1861_v13 = vadd.s32 1, %v2115_v50 }
 0x305   :  { %v1285_v53 = vadd.s32 1, %v3522_v1  ;;  %v1655_v2 = vsel %vm1654_vm9, %v1653_v26, 0  ;;  %v2105_v7 = vadd.s32 4294967294, %v1607_v10  ;;  %v2100_v58 = vmin.u32 %v1501_v27, %v3513_v61 }
 0x306   :  { %v1282_v51 = vmul.u32 %v1275_v21, %v1266_v4  ;;  %v1657_v25 = vand.u32 31, %v1655_v2  ;;  %v1196_v12 = vshll.u32 %v3418_v37, %v3475_v49  ;;  %v1643_v15 = vand.u32 2147483647, %v3490_v47 }
 0x307   :  { %v1286_v52 = vsel %vm1284_vm11, %v1285_v53, %v3522_v1  ;;  %v3543_v54 = vor.u32 %v1821_v34, %v1820_v36  ;;  %v1825_v50 = vshll.u32 %v1824_v16, 23  ;;  %v1203_v43 = vand.u32 2147483647, %v1202_v45 }
 0x308   :  { %v1287_v35 = vadd.s32 %v1286_v52, %v1282_v51  ;;  %v1658_v28 = vsub.s32 32, %v1657_v25  ;;  %v1198_v63 = vor.u32 %v1197_v31, %v1196_v12  ;;  %vm1862_vm12 = vcmp.gt.s32.totalorder %v1861_v13, 0 }
 0x309   :  { %vm2106_vm13 = vcmp.lt.s32.totalorder %v2105_v7, 0  ;;  %v1503_v19 = vclz %v2100_v58  ;;  %v1650_v37 = vand.u32 8388607, %v1643_v15  ;;  %v3899_v20 = vmov 920167782  }
 0x30a   :  { %v1288_v39 = vadd.s32 536870912, %v1287_v35  ;;  %v1661_v21 = vshrl.u32 %v2338_v44, %v1658_v28  ;;  %v1664_v49 = vshrl.u32 %v2339_v46, %v1658_v28  ;;  %v1667_v14 = vshrl.u32 %v2340_v48, %v1658_v28 }
 0x30b   :  { %v1670_v29 = vshrl.u32 %v3899_v20, %v1658_v28  ;;  %v3900_v41 = vmov 683565275   ;;  %v1663_v3 = vshll.u32 %v2338_v44, %v1657_v25  ;;  %v1673_v1 = vshrl.u32 %v3898_v38, %v1658_v28 }
 0x30c   :  { %v3551_v42 = vshrl.u32 %v1288_v39, 30  ;;  %v1660_v9 = vshll.u32 %v3900_v41, %v1657_v25  ;;  %v1656_v26 = vshrl.u32 %v1655_v2, 5  ;;  %v1666_v62 = vshll.u32 %v2339_v46, %v1657_v25 }
 0x30d   :  { %v1669_v22 = vshll.u32 %v2340_v48, %v1657_v25  ;;  %v1672_v10 = vshll.u32 %v3899_v20, %v1657_v25  ;;  %v1205_v27 = vcvt.s32.f32 %v1198_v63  ;;  %v1665_v34 = vor.u32 %v1664_v49, %v1663_v3 }
 0x30e   :  { %v1290_v36 = vshll.u32 %v3551_v42, 30  ;;  %v1662_v4 = vor.u32 %v1661_v21, %v1660_v9  ;;  %v3560_v16 = vor.u32 4788187, %v1825_v50  ;;  %v1668_v31 = vor.u32 %v1667_v14, %v1666_v62 }
 0x30f   :  { %v1671_v45 = vor.u32 %v1670_v29, %v1669_v22  ;;  %v1674_v53 = vor.u32 %v1673_v1, %v1672_v10  ;;  %v1206_v58 = vmul.f32 %v1205_v27, %v1203_v43  ;;  %v3563_v51 = vsel %vm2106_vm13, 0, %v2105_v7 }
 0x310   :  { %v1863_v2 = vsel %vm1862_vm12, %v1861_v13, 0  ;;  %v3566_v12 = vsub.s32 %v1287_v35, %v1290_v36  ;;  %v2101_v52 = vadd.s32 4294967294, %v1503_v19  ;;  %v1651_v25 = vor.u32 8388608, %v1650_v37 }
 0x311   :  { %v1659_v63 = vshrl.u32 %v3900_v41, %v1658_v28  ;;  %vm1675_vm10 = vcmp.lt.s32.totalorder %v1656_v26, 1  ;;  %vm1677_vm14 = vcmp.lt.s32.totalorder %v1656_v26, 3  ;;  %vm1678_vm15 = vcmp.lt.s32.totalorder %v1656_v26, 4 }
 0x312   :  { %v1293_v39 = vsub.s32 0, %v3566_v12  ;;  %v1683_v50 = vsel %vm1675_vm10, %v1662_v4, %v1665_v34  ;;  %v1680_v21 = vsel %vm1678_vm15, %v1668_v31, 2102212464  ;;  %v1684_v43 = vsel %vm1678_vm15, %v1671_v45, 920167782 }
 0x313   :  { %v1687_v7 = vsel %vm1675_vm10, %v1665_v34, %v1668_v31  ;;  %v1688_v49 = vsel %vm1678_vm15, %v1674_v53, 1326507024  ;;  %vm1676_vm0 = vcmp.lt.s32.totalorder %v1656_v26, 2  ;;  %v1685_v35 = vsel %vm1677_vm14, %v1668_v31, %v1684_v43 }
 0x314   :  { %v2092_v13 = vmin.u32 %v1293_v39, %v3566_v12  ;;  %v1689_v19 = vsel %vm1677_vm14, %v1671_v45, %v1688_v49  ;;  %vm2102_vm1 = vcmp.lt.s32.totalorder %v2101_v52, 0  ;;  %v1686_v28 = vsel %vm1676_vm0, %v1683_v50, %v1685_v35 }
 0x315   :  { %v1690_v37 = vsel %vm1676_vm0, %v1687_v7, %v1689_v19  ;;  %v1691_v14 = vshll.u32 %v1651_v25, 8  ;;  %v3577_v29 = vand.u32 31, %v1863_v2  ;;  %v1679_v3 = vsel %vm1675_vm10, %v1659_v63, %v1662_v4 }
 0x316   :  { %v1295_v9 = vclz %v2092_v13  ;;  %v1681_v1 = vsel %vm1677_vm14, %v1665_v34, %v1680_v21  ;;  %vm1125_vm4 = vcmp.lt.s32.totalorder %v3146_v8, 0  ;;  %v3589_v36 = vsel %vm2102_vm1, 0, %v2101_v52 }
 0x317   :  { %v3581_v62 = vmul.u32.u64.low %v1691_v14, %v1690_v37  ;;  %v3582_v22 = vmul.u32.u64.high %v1691_v14, %v1690_v37, %v3581_v62  ;;  %v3584_v10 = vmul.u32.u64.low %v1691_v14, %v1686_v28  ;;  %v3585_v27 = vmul.u32.u64.high %v1691_v14, %v1686_v28, %v3584_v10 }
 0x318   :  { %v2093_v31 = vadd.s32 4294967294, %v1295_v9  ;;  %v1829_v45 = vcvt.s32.f32 %v3543_v54  ;;  %v1209_v53 = vsub.s32 4, %v3392_v18  ;;  %v1615_v4 = vsub.s32 4294967266, %v3563_v51 }
 0x319   :  { %v1682_v34 = vsel %vm1676_vm0, %v1679_v3, %v1681_v1  ;;  %v1827_v25 = vand.u32 2147483647, %v3560_v16  ;;  %v1207_v63 = vxor.u32 2147483648, %v1206_v58  ;;  %v3597_v39 = vsub.s32 32, %v3577_v29 }
 0x31a   :  { %vm2094_vm5 = vcmp.lt.s32.totalorder %v2093_v31, 0  ;;  %v1511_v50 = vsub.s32 4294967266, %v3589_v36  ;;  %vm1700_vm2 = vc.u32 %v3582_v22, %v3584_v10  ;;  %v1701_v21 = vadd.s32 1, %v3585_v27 }
 0x31b   :  { %v1298_v52 = vsel %vm2094_vm5, 0, %v2093_v31  ;;  %v1283_v43 = vadd.s32 %v3521_v59, %v3519_v40  ;;  %v1698_v49 = vmul.u32 %v1691_v14, %v1682_v34  ;;  %v3608_v13 = vsel %vm1125_vm4, %v1209_v53, %v3392_v18 }
 0x31c   :  { %v1299_v26 = vsub.s32 32, %v1298_v52  ;;  %v1303_v7 = vsub.s32 4294967266, %v1298_v52  ;;  %v1611_v35 = vsub.s32 32, %v3563_v51  ;;  %v1616_v19 = vadd.s32 127, %v1615_v4 }
 0x31d   :  { %v1702_v28 = vsel %vm1700_vm2, %v1701_v21, %v3585_v27  ;;  %v1595_v37 = vadd.s32 %v3409_v0, %v3414_v11  ;;  %v1208_v40 = vsel %vm1125_vm4, %v1207_v63, %v1206_v58  ;;  %v3616_v59 = vshrl.u32 %v1863_v2, 5 }
 0x31e   :  { %v1301_v9 = vshrl.u32 %v1283_v43, %v1299_v26  ;;  %v1304_v3 = vadd.s32 127, %v1303_v7  ;;  %v1703_v1 = vadd.s32 %v1702_v28, %v1698_v49  ;;  %v1878_v18 = vshrl.u32 %v3899_v20, %v3597_v39 }
 0x31f   :  { %v1881_v14 = vshrl.u32 %v3898_v38, %v3597_v39  ;;  %v1512_v62 = vadd.s32 127, %v1511_v50  ;;  %v1300_v27 = vshll.u32 %v3566_v12, %v1298_v52  ;;  %v1613_v0 = vshrl.u32 %v1595_v37, %v1611_v35 }
 0x320   :  { %v1305_v31 = vshll.u32 %v1304_v3, 23  ;;  %v1704_v53 = vadd.s32 536870912, %v1703_v1  ;;  %v1617_v11 = vshll.u32 %v1616_v19, 23  ;;  %v1877_v4 = vshll.u32 %v2340_v48, %v3577_v29 }
 0x321   :  { %v1880_v58 = vshll.u32 %v3899_v20, %v3577_v29  ;;  %v1302_v2 = vor.u32 %v1301_v9, %v1300_v27  ;;  %v1851_v21 = vand.u32 2147483647, %v3478_v30  ;;  %v3901_v38 = vand.u32 2147483647, %v3146_v8 }
 0x322   :  { %v1306_v34 = vor.u32 4788187, %v1305_v31  ;;  %v3627_v63 = vshrl.u32 %v1704_v53, 30  ;;  %v1491_v50 = vadd.s32 %v3459_v17, %v3464_v24  ;;  %v1879_v52 = vor.u32 %v1878_v18, %v1877_v4 }
 0x323   :  { %vm3632_vm3 = vcmp.le.f32.partialorder %v3901_v38, 0.7853982  ;;  %vm1886_vm6 = vcmp.lt.s32.totalorder %v3616_v59, 4  ;;  %v1869_v20 = vshrl.u32 %v2338_v44, %v3597_v39  ;;  %v1507_v43 = vsub.s32 32, %v3589_v36 }
 0x324   :  { %v1513_v26 = vshll.u32 %v1512_v62, 23  ;;  %v1882_v7 = vor.u32 %v1881_v14, %v1880_v58  ;;  %v1706_v49 = vshll.u32 %v3627_v63, 30  ;;  %v1307_v35 = vand.u32 2147483647, %v1306_v34 }
 0x325   :  { %v1868_v19 = vshll.u32 %v3900_v41, %v3577_v29  ;;  %v1871_v28 = vshll.u32 %v2338_v44, %v3577_v29  ;;  %v1872_v17 = vshrl.u32 %v2339_v46, %v3597_v39  ;;  %v3649_v24 = vor.u32 4788187, %v1617_v11 }
 0x326   :  { %v1309_v37 = vcvt.s32.f32 %v1302_v2  ;;  %v3651_v9 = vsub.s32 %v1703_v1, %v1706_v49  ;;  %v1858_v3 = vand.u32 8388607, %v1851_v21  ;;  %v1874_v62 = vshll.u32 %v2339_v46, %v3577_v29 }
 0x327   :  { %v1870_v18 = vor.u32 %v1869_v20, %v1868_v19  ;;  %v1873_v14 = vor.u32 %v1872_v17, %v1871_v28  ;;  %v1875_v27 = vshrl.u32 %v2340_v48, %v3597_v39  ;;  %v1509_v44 = vshrl.u32 %v1491_v50, %v1507_v43 }
 0x328   :  { %v1892_v31 = vsel %vm1886_vm6, %v1879_v52, 920167782  ;;  %v1896_v53 = vsel %vm1886_vm6, %v1882_v7, 1326507024  ;;  %v1709_v1 = vsub.s32 0, %v3651_v9  ;;  %v1508_v11 = vshll.u32 %v3513_v61, %v3589_v36 }
 0x329   :  { %v1514_v4 = vor.u32 4788187, %v1513_v26  ;;  %vm1229_vm7 = vcmp.lt.s32.totalorder %v3429_v5, 0  ;;  %v1310_v58 = vmul.f32 %v1309_v37, %v1307_v35  ;;  %v1876_v46 = vor.u32 %v1875_v27, %v1874_v62 }
 0x32a   :  { %v2108_v29 = vmin.u32 %v1709_v1, %v3651_v9  ;;  %v1859_v48 = vor.u32 8388608, %v1858_v3  ;;  %vm1883_vm8 = vcmp.lt.s32.totalorder %v3616_v59, 1  ;;  %vm1885_vm9 = vcmp.lt.s32.totalorder %v3616_v59, 3 }
 0x32b   :  { %v1891_v2 = vsel %vm1883_vm8, %v1870_v18, %v1873_v14  ;;  %v1893_v34 = vsel %vm1885_vm9, %v1876_v46, %v1892_v31  ;;  %v1895_v61 = vsel %vm1883_vm8, %v1873_v14, %v1876_v46  ;;  %v1897_v36 = vsel %vm1885_vm9, %v1879_v52, %v1896_v53 }
 0x32c   :  { %v1211_v38 = vsel %vm3632_vm3, %v3146_v8, %v1208_v40  ;;  %v1612_v50 = vshll.u32 %v3484_v57, %v3563_v51  ;;  %v1510_v20 = vor.u32 %v1509_v44, %v1508_v11  ;;  %v1711_v43 = vclz %v2108_v29 }
 0x32d   :  { %v1311_v26 = vxor.u32 2147483648, %v1310_v58  ;;  %v1867_v7 = vshrl.u32 %v3900_v41, %v3597_v39  ;;  %vm1884_vm11 = vcmp.lt.s32.totalorder %v3616_v59, 2  ;;  %v1888_v49 = vsel %vm1886_vm6, %v1876_v46, 2102212464 }
 0x32e   :  { %v2109_v35 = vadd.s32 4294967294, %v1711_v43  ;;  %v1894_v52 = vsel %vm1884_vm11, %v1891_v2, %v1893_v34  ;;  %v1898_v40 = vsel %vm1884_vm11, %v1895_v61, %v1897_v36  ;;  %v1899_v19 = vshll.u32 %v1859_v48, 8 }
 0x32f   :  { %v1614_v57 = vor.u32 %v1613_v0, %v1612_v50  ;;  %v1619_v51 = vand.u32 2147483647, %v3649_v24  ;;  %v1515_v28 = vand.u32 2147483647, %v1514_v4  ;;  %v1887_v41 = vsel %vm1883_vm8, %v1867_v7, %v1870_v18 }
 0x330   :  { %vm2110_vm12 = vcmp.lt.s32.totalorder %v2109_v35, 0  ;;  %v1889_v39 = vsel %vm1885_vm9, %v1873_v14, %v1888_v49  ;;  %v3697_v17 = vmul.u32.u64.low %v1899_v19, %v1898_v40  ;;  %v3698_v37 = vmul.u32.u64.high %v1899_v19, %v1898_v40, %v3697_v17 }
 0x331   :  { %v1517_v3 = vcvt.s32.f32 %v1510_v20  ;;  %v1714_v62 = vsel %vm2110_vm12, 0, %v2109_v35  ;;  %v3700_v27 = vmul.u32.u64.low %v1899_v19, %v1894_v52  ;;  %v3701_v44 = vmul.u32.u64.high %v1899_v19, %v1894_v52, %v3700_v27 }
 0x332   :  { %v1312_v0 = vsel %vm1229_vm7, %v1311_v26, %v1310_v58  ;;  %v1699_v24 = vadd.s32 %v3584_v10, %v3582_v22  ;;  %v1715_v18 = vsub.s32 32, %v1714_v62  ;;  %v1719_v31 = vsub.s32 4294967266, %v1714_v62 }
 0x333   :  { %v1621_v53 = vcvt.s32.f32 %v1614_v57  ;;  %v1518_v1 = vmul.f32 %v1517_v3, %v1515_v28  ;;  %v3904_v14 = vand.u32 2147483647, %v3429_v5  ;;  %v1890_v4 = vsel %vm1884_vm11, %v1887_v41, %v1889_v39 }
 0x334   :  { %v1716_v46 = vshll.u32 %v3651_v9, %v1714_v62  ;;  %v1717_v29 = vshrl.u32 %v1699_v24, %v1715_v18  ;;  %v1720_v58 = vadd.s32 127, %v1719_v31  ;;  %vm1908_vm10 = vc.u32 %v3698_v37, %v3700_v27 }
 0x335   :  { %vm3710_vm13 = vcmp.le.f32.partialorder %v3904_v14, 0.7853982  ;;  %v1830_v22 = vmul.f32 %v1829_v45, %v1827_v25  ;;  %2285 = vcosq.f32 %v1211_v38  ;;  %v1909_v59 = vadd.s32 1, %v3701_v44 }
 0x336   :  { %v1315_v10 = vsel %vm3710_vm13, %v3429_v5, %v1312_v0  ;;  %v1622_v48 = vmul.f32 %v1621_v53, %v1619_v51  ;;  %v1718_v2 = vor.u32 %v1717_v29, %v1716_v46  ;;  %v1721_v9 = vshll.u32 %v1720_v58, 23 }
 0x337   :  { %v1906_v34 = vmul.u32 %v1899_v19, %v1890_v4  ;;  %2287 = vsinq.f32 %v1211_v38  ;;  %v1519_v61 = vxor.u32 2147483648, %v1518_v1  ;;  %v1313_v36 = vsub.s32 4, %v3551_v42 }
 0x338   :  { %v1910_v16 = vsel %vm1908_vm10, %v1909_v59, %v3701_v44  ;;  %v1212_v54 = vsel %vm3632_vm3, 0, %v3608_v13  ;;  %2289 = vcosq.f32 %v1315_v10  ;;  %v1722_v45 = vor.u32 4788187, %v1721_v9 }
 0x339   :  { %v1911_v25 = vadd.s32 %v1910_v16, %v1906_v34  ;;  %vm1437_vm14 = vcmp.lt.s32.totalorder %v3390_v60, 0  ;;  %2291 = vsinq.f32 %v1315_v10  ;;  %v1623_v50 = vxor.u32 2147483648, %v1622_v48 }
 0x33a   :  { %v1723_v20 = vand.u32 2147483647, %v1722_v45  ;;  %v1725_v43 = vcvt.s32.f32 %v1718_v2  ;;  %v1216_v38 = vadd.s32 3, %v1212_v54  ;;  %v1520_v7 = vsel %vm1437_vm14, %v1519_v61, %v1518_v1 }
 0x33b   :  { %v1912_v26 = vadd.s32 536870912, %v1911_v25  ;;  %v1314_v49 = vsel %vm1229_vm7, %v1313_v36, %v3551_v42  ;;  %v1831_v12 = vxor.u32 2147483648, %v1830_v22  ;;  %v1833_v52 = vsub.s32 4, %v3379_v6 }
 0x33c   :  { %v1726_v13 = vmul.f32 %v1725_v43, %v1723_v20  ;;  %vm1541_vm15 = vcmp.lt.s32.totalorder %v3177_v33, 0  ;;  %v3907_v40 = vand.u32 2147483647, %v3390_v60  ;;  %v1316_v51 = vsel %vm3710_vm13, 0, %v1314_v49 }
 0x33d   :  { %v3738_v35 = vshrl.u32 %v1912_v26, 30  ;;  %v1624_v57 = vsel %vm1541_vm15, %v1623_v50, %v1622_v48  ;;  %vm1749_vm1 = vcmp.lt.s32.totalorder %v3129_v32, 0  ;;  %v1217_v39 = vand.u32 3, %v1216_v38 }
 0x33e   :  { %vm3744_vm0 = vcmp.le.f32.partialorder %v3907_v40, 0.7853982  ;;  %v3910_v17 = vand.u32 2147483647, %v3177_v33  ;;  %v1832_v62 = vsel %vm1749_vm1, %v1831_v12, %v1830_v22  ;;  %v1625_v44 = vsub.s32 4, %v3466_v23 }
 0x33f   :  { %v1523_v42 = vsel %vm3744_vm0, %v3390_v60, %v1520_v7  ;;  %v1914_v28 = vshll.u32 %v3738_v35, 30  ;;  %v2286_v41 = vpop.eup %2285  ;;  %v1727_v0 = vxor.u32 2147483648, %v1726_v13  ;;  %v1521_v53 = vsub.s32 4, %v3493_v55 }
 0x340   :  { %vm3759_vm4 = vcmp.le.f32.partialorder %v3910_v17, 0.7853982  ;;  %2293 = vcosq.f32 %v1523_v42  ;;  %v1320_v1 = vadd.s32 3, %v1316_v51  ;;  %v3913_v11 = vand.u32 2147483647, %v3129_v32 }
 0x341   :  { %v3764_v24 = vsub.s32 %v1911_v25, %v1914_v28  ;;  %v2288_v18 = vpop.eup %2287  ;;  %v1627_v31 = vsel %vm3759_vm4, %v3177_v33, %v1624_v57  ;;  %v3777_v46 = vsel %vm1749_vm1, %v1833_v52, %v3379_v6  ;;  %2295 = vsinq.f32 %v1523_v42 }
 0x342   :  { %v2290_v14 = vpop.eup %2289  ;;  %vm3772_vm5 = vcmp.le.f32.partialorder %v3913_v11, 0.7853982  ;;  %vm1218_vm2 = vcmp.lt.s32.totalorder %v1217_v39, 2  ;;  %v1223_v10 = vxor.u32 2147483648, %v2286_v41  ;;  %vm1645_vm3 = vcmp.lt.s32.totalorder %v3490_v47, 0 }
 0x343   :  { %v1917_v29 = vsub.s32 0, %v3764_v24  ;;  %v2292_v58 = vpop.eup %2291  ;;  %v1835_v22 = vsel %vm3772_vm5, %v3129_v32, %v1832_v62  ;;  %v1220_v59 = vxor.u32 2147483648, %v2288_v18  ;;  %2297 = vcosq.f32 %v1627_v31 }
 0x344   :  { %v1728_v48 = vsel %vm1645_vm3, %v1727_v0, %v1726_v13  ;;  %vm1215_vm6 = vweird.f32 %v3146_v8  ;;  %v1626_v2 = vsel %vm1541_vm15, %v1625_v44, %v3466_v23  ;;  %2299 = vsinq.f32 %v1627_v31  ;;  %v1966_v0 = vpop.permute.xlu0 %1965 }
 0x345   :  { %v2116_v6 = vmin.u32 %v1917_v29, %v3764_v24  ;;  %v1522_v9 = vsel %vm1437_vm14, %v1521_v53, %v3493_v55  ;;  %v1321_v34 = vand.u32 3, %v1320_v1  ;;  %v1324_v61 = vxor.u32 2147483648, %v2292_v58 }
 0x346   :  { %v1327_v36 = vxor.u32 2147483648, %v2290_v14  ;;  %vm3796_vm7 = vcmp.le.f32.partialorder %v1643_v15, 0.7853982  ;;  %2301 = vsinq.f32 %v1835_v22  ;;  %vm1219_vm8 = vcmp.eq.s32.totalorder %v1217_v39, 0 }
 0x347   :  { %v1919_v54 = vclz %v2116_v6  ;;  %vm1222_vm9 = vcmp.eq.s32.totalorder %v1217_v39, 2  ;;  %v1731_v23 = vsel %vm3796_vm7, %v3490_v47, %v1728_v48  ;;  %v1221_v45 = vsel %vm1219_vm8, %v2286_v41, %v1220_v59 }
 0x348   :  { %v1224_v25 = vsel %vm1222_vm9, %v1223_v10, %v2288_v18  ;;  %v1524_v55 = vsel %vm3744_vm0, 0, %v1522_v9  ;;  %v1628_v15 = vsel %vm3759_vm4, 0, %v1626_v2  ;;  %vm1323_vm11 = vcmp.eq.s32.totalorder %v1321_v34, 0 }
 0x349   :  { %v2117_v50 = vadd.s32 4294967294, %v1919_v54  ;;  %vm1326_vm12 = vcmp.eq.s32.totalorder %v1321_v34, 2  ;;  %v1729_v20 = vsub.s32 4, %v3627_v63  ;;  %v1325_v43 = vsel %vm1323_vm11, %v2290_v14, %v1324_v61 }
 0x34a   :  { %v1328_v26 = vsel %vm1326_vm12, %v1327_v36, %v2292_v58  ;;  %2303 = vcosq.f32 %v1731_v23  ;;  %v2294_v38 = vpop.eup %2293  ;;  %v1225_v7 = vsel %vm1218_vm2, %v1221_v45, %v1224_v25  ;;  %v1528_v49 = vadd.s32 3, %v1524_v55  ;;  %v1976_v55 = vpop.permute.xlu0 %1975 }
 0x34b   :  { %vm2118_vm13 = vcmp.lt.s32.totalorder %v2117_v50, 0  ;;  %2305 = vsinq.f32 %v1731_v23  ;;  %v2296_v13 = vpop.eup %2295  ;;  %vm1322_vm10 = vcmp.lt.s32.totalorder %v1321_v34, 2  ;;  %v1907_v52 = vadd.s32 %v3700_v27, %v3698_v37 }
 0x34c   :  { %v1922_v12 = vsel %vm2118_vm13, 0, %v2117_v50  ;;  %2307 = vcosq.f32 %v1835_v22  ;;  %v1632_v57 = vadd.s32 3, %v1628_v15  ;;  %v1329_v42 = vsel %vm1322_vm10, %v1325_v43, %v1328_v26 }
 0x34d   :  { %v1923_v40 = vsub.s32 32, %v1922_v12  ;;  %v1927_v19 = vsub.s32 4294967266, %v1922_v12  ;;  %v1730_v51 = vsel %vm1645_vm3, %v1729_v20, %v3627_v63  ;;  %v2298_v28 = vpop.eup %2297  ;;  %v1226_v41 = vsel %vm1215_vm6, nan, %v1225_v7 }
 0x34e   :  { %v1924_v39 = vshll.u32 %v3764_v24, %v1922_v12  ;;  %v2300_v62 = vpop.eup %2299  ;;  %v1529_v44 = vand.u32 3, %v1528_v49  ;;  %vm1319_vm14 = vweird.f32 %v3429_v5  ;;  %v1532_v37 = vxor.u32 2147483648, %v2296_v13  ;;  %v1971_v24 = vpop.permute.xlu1 %1970 }
 0x34f   :  { %v1925_v17 = vshrl.u32 %v1907_v52, %v1923_v40  ;;  %v1928_v3 = vadd.s32 127, %v1927_v19  ;;  %v1535_v27 = vxor.u32 2147483648, %v2294_v38  ;;  %v1330_v18 = vsel %vm1319_vm14, nan, %v1329_v42 }
 0x350   :  { %v1732_v31 = vsel %vm3796_vm7, 0, %v1730_v51  ;;  %v3820_v1 = vpop.eup %2301  ;;  %v2003_v8 = vmul.f32 %v1966_v0, %v1226_v41  ;;  %v1633_v14 = vand.u32 3, %v1632_v57  ;;  %vm1527_vm15 = vweird.f32 %v3390_v60 }
 0x351   :  { %v1926_v63 = vor.u32 %v1925_v17, %v1924_v39  ;;  %v1929_v53 = vshll.u32 %v1928_v3, 23  ;;  %v1636_v11 = vxor.u32 2147483648, %v2300_v62  ;;  %v1639_v29 = vxor.u32 2147483648, %v2298_v28  ;;  %v1986_v39 = vpop.permute.xlu0 %1985 }
 0x352   :  { %v1836_v5 = vsel %vm3772_vm5, 0, %v3777_v46  ;;  %v2004_v22 = vmul.f32 %v1971_v24, %v1330_v18  ;;  %v1736_v10 = vadd.s32 3, %v1732_v31  ;;  %vm1531_vm0 = vcmp.eq.s32.totalorder %v1529_v44, 0  ;;  %v1981_v40 = vpop.permute.xlu1 %1980 }
 0x353   :  { %v1930_v58 = vor.u32 4788187, %v1929_v53  ;;  %vm1534_vm1 = vcmp.eq.s32.totalorder %v1529_v44, 2  ;;  %v1533_v48 = vsel %vm1531_vm0, %v2294_v38, %v1532_v37  ;;  %v1933_v9 = vcvt.s32.f32 %v1926_v63 }
 0x354   :  { %v2304_v59 = vpop.eup %2303  ;;  %v1536_v6 = vsel %vm1534_vm1, %v1535_v27, %v2296_v13  ;;  %vm1530_vm4 = vcmp.lt.s32.totalorder %v1529_v44, 2  ;;  %vm1635_vm2 = vcmp.eq.s32.totalorder %v1633_v14, 0  ;;  %vm1638_vm3 = vcmp.eq.s32.totalorder %v1633_v14, 2 }
 0x355   :  { %v1931_v2 = vand.u32 2147483647, %v1930_v58  ;;  %v2306_v34 = vpop.eup %2305  ;;  %v1840_v61 = vadd.s32 3, %v1836_v5  ;;  %v1637_v36 = vsel %vm1635_vm2, %v2298_v28, %v1636_v11  ;;  %v1640_v16 = vsel %vm1638_vm3, %v1639_v29, %v2300_v62  ;;  %v1996_v11 = vpop.permute.xlu0 %1995 }
 0x356   :  { %v1937_v4 = vsub.s32 4, %v3738_v35  ;;  %v2308_v46 = vpop.eup %2307  ;;  %vm1853_vm5 = vcmp.lt.s32.totalorder %v3478_v30, 0  ;;  %v1737_v23 = vand.u32 3, %v1736_v10  ;;  %v1537_v45 = vsel %vm1530_vm4, %v1533_v48, %v1536_v6  ;;  %v1991_v0 = vpop.permute.xlu1 %1990 }
 0x357   :  { %v1934_v54 = vmul.f32 %v1933_v9, %v1931_v2  ;;  %v2011_v25 = vadd.f32 %v2004_v22, %v2003_v8  ;;  %vm1634_vm6 = vcmp.lt.s32.totalorder %v1633_v14, 2  ;;  %v1740_v50 = vxor.u32 2147483648, %v2306_v34 }
 0x358   :  { %v1743_v15 = vxor.u32 2147483648, %v2304_v59  ;;  %v1641_v43 = vsel %vm1634_vm6, %v1637_v36, %v1640_v16  ;;  %v1841_v26 = vand.u32 3, %v1840_v61  ;;  %v1844_v38 = vxor.u32 2147483648, %v3820_v1 }
 0x359   :  { %v1935_v20 = vxor.u32 2147483648, %v1934_v54  ;;  %v2005_v7 = vmul.f32 %v1976_v55, %v3406_v56  ;;  %v1538_v49 = vsel %vm1527_vm15, nan, %v1537_v45  ;;  %vm3834_vm7 = vcmp.le.f32.partialorder %v1851_v21, 0.7853982 }
 0x35a   :  { %v1938_v52 = vsel %vm1853_vm5, %v1937_v4, %v3738_v35  ;;  %vm1739_vm8 = vcmp.eq.s32.totalorder %v1737_v23, 0  ;;  %vm1742_vm9 = vcmp.eq.s32.totalorder %v1737_v23, 2  ;;  %v1847_v57 = vxor.u32 2147483648, %v2308_v46  ;;  %v2001_v10 = vpop.permute.xlu1 %2000 }
 0x35b   :  { %v1936_v13 = vsel %vm1853_vm5, %v1935_v20, %v1934_v54  ;;  %v2012_v56 = vadd.f32 %v2011_v25, %v2005_v7  ;;  %v1741_v19 = vsel %vm1739_vm8, %v2304_v59, %v1740_v50  ;;  %v1744_v21 = vsel %vm1742_vm9, %v1743_v15, %v2306_v34 }
 0x35c   :  { %v1939_v60 = vsel %vm3834_vm7, %v3478_v30, %v1936_v13  ;;  %vm1631_vm11 = vweird.f32 %v3177_v33  ;;  %v1940_v42 = vsel %vm3834_vm7, 0, %v1938_v52  ;;  %v2006_v51 = vmul.f32 %v1981_v40, %v1538_v49 }
 0x35d   :  { %2309 = vcosq.f32 %v1939_v60  ;;  %v1642_v35 = vsel %vm1631_vm11, nan, %v1641_v43  ;;  %vm1738_vm12 = vcmp.lt.s32.totalorder %v1737_v23, 2  ;;  %vm1843_vm13 = vcmp.eq.s32.totalorder %v1841_v26, 0 }
 0x35e   :  { %2311 = vsinq.f32 %v1939_v60  ;;  %v1745_v28 = vsel %vm1738_vm12, %v1741_v19, %v1744_v21  ;;  %vm1846_vm10 = vcmp.eq.s32.totalorder %v1841_v26, 2  ;;  %v2013_v41 = vadd.f32 %v2012_v56, %v2006_v51 }
 0x35f   :  { %v1845_v17 = vsel %vm1843_vm13, %v2308_v46, %v1844_v38  ;;  %v1848_v3 = vsel %vm1846_vm10, %v1847_v57, %v3820_v1  ;;  %v1944_v62 = vadd.s32 3, %v1940_v42  ;;  %vm1735_vm14 = vweird.f32 %v3490_v47 }
 0x360   :  { %v2007_v44 = vmul.f32 %v1986_v39, %v1642_v35  ;;  %v1746_v33 = vsel %vm1735_vm14, nan, %v1745_v28  ;;  %vm1842_vm15 = vcmp.lt.s32.totalorder %v1841_v26, 2  ;;  %vm1839_vm0 = vweird.f32 %v3129_v32 }
 0x361   :  { %v1849_v37 = vsel %vm1842_vm15, %v1845_v17, %v1848_v3  ;;  %v1945_v18 = vand.u32 3, %v1944_v62  ;;  %v2008_v31 = vmul.f32 %v1991_v0, %v1746_v33  ;;  %vm1943_vm3 = vweird.f32 %v3478_v30 }
 0x362   :  { %v2014_v27 = vadd.f32 %v2013_v41, %v2007_v44  ;;  %v1850_v53 = vsel %vm1839_vm0, nan, %v1849_v37 }
 0x363   :  { %vm1950_vm1 = vcmp.eq.s32.totalorder %v1945_v18, 2  ;;  %vm1947_vm4 = vcmp.eq.s32.totalorder %v1945_v18, 0  ;;  %v2009_v29 = vmul.f32 %v1996_v11, %v1850_v53  ;;  %vm1946_vm2 = vcmp.lt.s32.totalorder %v1945_v18, 2 }
 0x364   :  { %v2015_v24 = vadd.f32 %v2014_v27, %v2008_v31 }
 0x366   :  { %v2016_v22 = vadd.f32 %v2015_v24, %v2009_v29 }
 0x367   :  { %v2310_v63 = vpop.eup %2309 }
 0x368   :  { %v2312_v8 = vpop.eup %2311  ;;  %v1951_v14 = vxor.u32 2147483648, %v2310_v63 }
 0x369   :  { %v1948_v1 = vxor.u32 2147483648, %v2312_v8 }
 0x36a   :  { %v1952_v47 = vsel %vm1950_vm1, %v1951_v14, %v2312_v8 }
 0x36b   :  { %v1949_v5 = vsel %vm1947_vm4, %v2310_v63, %v1948_v1 }
 0x36c   :  { %v1953_v58 = vsel %vm1946_vm2, %v1949_v5, %v1952_v47 }
 0x36d   :  { %v1954_v32 = vsel %vm1943_vm3, nan, %v1953_v58 }
 0x36e   :  { %v2010_v59 = vmul.f32 %v2001_v10, %v1954_v32 }
 0x370   :  { %v2017_v48 = vadd.f32 %v2016_v22, %v2010_v59 }
 0x372   :  { %v2018_v6 = vrot.slane %v2017_v48, 4 }
 0x374   :  { %v2019_v2 = vadd.f32 %v2018_v6, %v2017_v48 }
 0x376   :  { %v2020_v9 = vrot.slane %v2019_v2, 2 }
 0x378   :  { %v2021_v34 = vadd.f32 %v2020_v9, %v2019_v2 }
 0x37a   :  { %v2022_v61 = vrot.slane %v2021_v34, 1 }
 0x37c   :  { %v2023_v36 = vadd.f32 %v2022_v61, %v2021_v34 }
 0x37e   :  { %2024 = vst [vmem:[#allocation2] sm:$0x1] %v2023_v36 }
 0x37f   :  { %2324 = shalt.err (!%p2321_p4)
}
 0x380   :  { %s2325_s17 = scalar_lea.hbm %s3870_s5, 16 }
 0x381   :  { %p2326_p5 = scmp.ne.s32.totalorder %s3870_s5, %s2325_s17  ;;  %p2329_p6 = scmp.lt.u32.totalorder %s2325_s17, %s3870_s5 }
 0x383   :  { %p2331_p7 = pnand %p2329_p6, %p2326_p5 }
 0x385   :  { %2334 = shalt.err (!%p2331_p7)
}
 0x386   :  { %2034 = dma.vmem_to_hbm [thread:$0]  %s2032_s12, 16, %s3870_s5, [#allocation3]  }
 0x387   :  { %2335 = dma.done.wait [#allocation3], 16  }
 0x388   :  { %2336 = vsyncadd [#allocation3], 4294967280 }
 0x389   :  { %2038 = vsyncpa [#allocation3], 1 }

</bundles_post_ra>
